<compile_context>
chip_gen: v7x
topology: tpu7x:2x2x1
jax: 0.10.0
libtpu: 0.0.40
codegen_flags: <defaults>
</compile_context>

<pallas_src>
import functools

import jax
import jax.numpy as jnp
from jax.experimental import pallas as pl
from jax.experimental.pallas import tpu as pltpu


def _cdan_kernel(gmin_ref, b2_ref, g_ref, f_ref, w_ref, w1_ref, b1_ref,
                 w2_ref, loss_ref, acc_ref, p_acc,
                 *, B, N, TN, C, H, scale, score_thr):
    # gmin_ref: (1,1) SMEM   global min of g (precomputed in wrapper)
    # b2_ref:   (1,1) SMEM   second-layer bias
    # g_ref:    (TN, C) f32  raw logits tile of concat([g_s; g_t])
    # f_ref:    (TN, TK) bf16 feature tile of concat([f_s; f_t])
    # w_ref:    (TN, 1) f32  [w_s; ones] tile
    # w1_ref:   (TK, C*H) bf16 repacked first-layer weight tile
    # b1_ref:   (1, H) f32,  w2_ref: (1, H) f32 (second-layer weight as a row)
    # loss_ref, acc_ref: (1,1) f32 resident accumulators
    # p_acc:    (TN, C*H) f32 VMEM scratch (hidden pre-activation accumulator)
    i = pl.program_id(0)          # batch tile
    k = pl.program_id(1)          # F-contraction tile
    nk = pl.num_programs(1)

    # ---- init the resident scalar accumulators exactly once
    @pl.when(jnp.logical_and(i == 0, k == 0))
    def _init_outputs():
        loss_ref[...] = jnp.zeros_like(loss_ref)
        acc_ref[...] = jnp.zeros_like(acc_ref)

    # ---- init the per-batch-tile hidden accumulator
    @pl.when(k == 0)
    def _init_acc():
        p_acc[...] = jnp.zeros_like(p_acc)

    # ---- MXU: one big bf16 matmul (f32 accumulate) replaces the per-class loop
    p_acc[...] += jnp.dot(f_ref[...], w1_ref[...],
                          preferred_element_type=jnp.float32)

    # ---- epilogue for this batch tile after the last contraction step
    @pl.when(k == nk - 1)
    def _finalize():
        g = g_ref[...].astype(jnp.float32)                       # (TN, C)

        # g normalization (scaled softmax). Global min comes from SMEM.
        g0 = g - gmin_ref[0, 0]
        rmax = jnp.max(g0, axis=1, keepdims=True)
        gsc = (scale * g0) / jnp.maximum(rmax, 1e-30)            # guard rmax==0
        ge = jnp.exp(gsc)
        gn = ge / jnp.sum(ge, axis=1, keepdims=True)             # (TN, C)
        # NOTE: exact divides kept here: O(TN*C) work off the MXU critical
        # path; pl.reciprocal(approx=True) perturbs logits enough to flip the
        # d>=0.5 accuracy metric on borderline samples.

        # class-conditioning: out[:, h] = sum_c gn[:, c] * P[:, c*H + h]
        P = p_acc[...]                                           # (TN, C*H)
        out = gn[:, 0:1] * P[:, 0:H]
        for c in range(1, C):                                    # static, VPU
            out = out + gn[:, c:c + 1] * P[:, c * H:(c + 1) * H]

        hid = jnp.maximum(out + b1_ref[...], 0.0)                # (TN, H) ReLU

        # Second Linear (H -> 1): VPU multiply + lane reduce instead of a
        # 1-lane-wide MXU matmul.
        logits = jnp.sum(hid * w2_ref[...], axis=1, keepdims=True) + b2_ref[0, 0]

        # labels: source (global row < B) = 1, target = 0
        row = i * TN + jax.lax.broadcasted_iota(jnp.int32, (TN, 1), 0)
        is_src = row < B
        y = is_src.astype(jnp.float32)

        # per-example weight: w_s for source; target weight 0 if the raw
        # logit max is below score_thr (open-set "unknown"), else 1.
        raw_max = jnp.max(g, axis=1, keepdims=True)
        unknown = jnp.logical_and(jnp.logical_not(is_src), raw_max < score_thr)
        weight = jnp.where(unknown, 0.0, w_ref[...])

        # stable BCE-with-logits:  softplus(z) - y*z
        sp = jnp.maximum(logits, 0.0) + jnp.log(1.0 + jnp.exp(-jnp.abs(logits)))
        bce = sp - y * logits

        part_loss = jnp.sum(weight * bce, axis=(0, 1), keepdims=True)
        correct = ((logits >= 0.0) == is_src).astype(jnp.float32)  # d>=0.5 <=> z>=0
        part_acc = jnp.sum(correct, axis=(0, 1), keepdims=True)

        loss_ref[...] += part_loss * (1.0 / N)
        acc_ref[...] += part_acc * (100.0 / N)


def cdan_loss(g_s, f_s, g_t, f_t, w_s, w1, b1, w2, b2,
              *, score_thr=-230.0, scale=12.0, block_n=64, block_k=128):
    B, C = g_s.shape
    F = f_s.shape[1]
    H = b1.shape[0]
    N = 2 * B
    assert w1.shape == (C * F, H) and w2.shape == (H, 1)

    TN = min(block_n, N)
    TK = min(block_k, F)
    assert N % TN == 0 and (TN % 8 == 0 or TN == N)
    assert F % TK == 0 and (TK % 128 == 0 or TK == F)

    f32, bf16 = jnp.float32, jnp.bfloat16

    # Glue (cheap, one-time): concat the activations in bf16 (half the copy
    # bytes of the old f32-upcast concat) and repack W1 (C*F,H) -> (F, C*H)
    # so the kernel does a single K=F matmul with a C*H-wide lane-dense output.
    g = jnp.concatenate([g_s, g_t], axis=0).astype(f32)                # (N, C)
    f = jnp.concatenate([f_s.astype(bf16), f_t.astype(bf16)], axis=0)  # (N, F)
    w_init = jnp.concatenate(
        [w_s.reshape(B, 1).astype(f32), jnp.ones((B, 1), f32)], axis=0)  # (N,1)
    w1_r = jnp.transpose(w1.astype(bf16).reshape(C, F, H),
                         (1, 0, 2)).reshape(F, C * H)                  # (F, C*H)
    b1_r = b1.reshape(1, H).astype(f32)
    w2_r = w2.reshape(1, H).astype(f32)
    b2_r = b2.reshape(1, 1).astype(f32)
    g_min = jnp.min(g).reshape(1, 1)              # cross-tile scalar -> SMEM

    kernel = functools.partial(
        _cdan_kernel, B=B, N=N, TN=TN, C=C, H=H,
        scale=float(scale), score_thr=float(score_thr))

    smem = pl.BlockSpec(memory_space=pltpu.MemorySpace.SMEM)
    grid = (N // TN, F // TK)

    loss, acc = pl.pallas_call(
        kernel,
        grid=grid,
        in_specs=[
            smem,                                              # g_min  (1,1)
            smem,                                              # b2     (1,1)
            pl.BlockSpec((TN, C), lambda i, k: (i, 0)),        # g
            pl.BlockSpec((TN, TK), lambda i, k: (i, k)),       # f
            pl.BlockSpec((TN, 1), lambda i, k: (i, 0)),        # w_init
            pl.BlockSpec((TK, C * H), lambda i, k: (k, 0)),    # W1 repacked
            pl.BlockSpec((1, H), lambda i, k: (0, 0)),         # b1
            pl.BlockSpec((1, H), lambda i, k: (0, 0)),         # w2 row
        ],
        out_specs=(pl.BlockSpec((1, 1), lambda i, k: (0, 0)),
                   pl.BlockSpec((1, 1), lambda i, k: (0, 0))),
        out_shape=(jax.ShapeDtypeStruct((1, 1), jnp.float32),
                   jax.ShapeDtypeStruct((1, 1), jnp.float32)),
        scratch_shapes=[pltpu.VMEM((TN, C * H), jnp.float32)],
        compiler_params=pltpu.CompilerParams(
            # Both grid axes carry accumulator state (p_acc over k, loss/acc
            # over i) -> "arbitrary".
            # TODO(synk): per-core partial loss/acc outputs would let the batch
            # axis be "parallel" on v7x's 2 TensorCores.
            dimension_semantics=("arbitrary", "arbitrary"),
            # Keep double-buffered W1 blocks well under v7x's 64 MiB physical
            # VMEM at production sizes (shrink block_k / block_n as needed).
            vmem_limit_bytes=32 * 1024 * 1024,
        ),
    )(g_min, b2_r, g, f, w_init, w1_r, b1_r, w2_r)
    return loss[0, 0], acc[0, 0]


def cdan_loss_ref(g_s, f_s, g_t, f_t, w_s, w1, b1, w2, b2,
                  score_thr=-230.0, scale=12.0):
    """Pure-JAX reference mirroring the PyTorch forward.

    It mirrors the kernel's precision policy for the MXU operands only
    (f and W1 rounded to bf16, f32 accumulation) so the comparison isolates
    kernel correctness rather than the bf16-weight quantization choice."""
    f32, bf16 = jnp.float32, jnp.bfloat16
    hi = jax.lax.Precision.HIGHEST
    B = g_s.shape[0]
    g = jnp.concatenate([g_s, g_t], 0).astype(f32)
    f = jnp.concatenate([f_s, f_t], 0).astype(bf16).astype(f32)
    w1_q = w1.astype(bf16).astype(f32)
    N = g.shape[0]
    w_t = jnp.where(jnp.max(g_t, axis=1) < score_thr, 0.0, 1.0)
    weight = jnp.concatenate([w_s, w_t], 0)[:, None].astype(f32)
    g0 = g - jnp.min(g)
    gsc = scale * g0 / jnp.max(g0, axis=1, keepdims=True)
    ge = jnp.exp(gsc)
    gn = ge / jnp.sum(ge, axis=1, keepdims=True)
    h = (gn[:, :, None] * f[:, None, :]).reshape(N, -1)          # MultiLinearMap
    hid = jnp.maximum(jnp.dot(h, w1_q, precision=hi) + b1, 0.0)
    d = jax.nn.sigmoid(jnp.dot(hid, w2, precision=hi) + b2)
    y = jnp.concatenate([jnp.ones((B, 1)), jnp.zeros((B, 1))], 0)
    bce = -(y * jnp.log(d) + (1.0 - y) * jnp.log(1.0 - d))
    loss = jnp.mean(weight * bce)
    acc = jnp.mean(((d >= 0.5).astype(f32) == y).astype(f32)) * 100.0
    return loss, acc


if __name__ == "__main__":
    key = jax.random.PRNGKey(0)
    # per-domain batch, classes, feature dim, discriminator hidden
    B, C, F, H = 64, 4, 256, 128   # -> grid (2 batch tiles, 2 K tiles)

    ks = jax.random.split(key, 9)
    g_s = jax.random.normal(ks[0], (B, C), jnp.float32)
    f_s = jax.random.normal(ks[1], (B, F), jnp.float32)
    g_t = jax.random.normal(ks[2], (B, C), jnp.float32)
    f_t = jax.random.normal(ks[3], (B, F), jnp.float32)
    w_s = jax.random.uniform(ks[4], (B,), jnp.float32, 0.5, 1.0)

    # Deterministic synthetic discriminator parameters:
    # Linear(C*F -> H) -> ReLU -> Linear(H -> 1) -> Sigmoid
    w1 = jax.random.normal(ks[5], (C * F, H), jnp.float32) * 0.05
    b1 = jax.random.normal(ks[6], (H,), jnp.float32) * 0.01
    w2 = jax.random.normal(ks[7], (H, 1), jnp.float32) * 0.05
    b2 = jax.random.normal(ks[8], (1,), jnp.float32) * 0.01

    # TODO(synk): the GRL warm-start coeff / auto_step iteration counter only
    # affects backward gradients (forward is identity), so it is not modeled.

    loss, acc = cdan_loss(g_s, f_s, g_t, f_t, w_s, w1, b1, w2, b2)
    jax.block_until_ready((loss, acc))

    loss_ref, acc_ref = cdan_loss_ref(g_s, f_s, g_t, f_t, w_s, w1, b1, w2, b2)
    assert jnp.allclose(loss, loss_ref, rtol=1e-3, atol=1e-3), (loss, loss_ref)
    # accuracy is a hard-threshold count; allow at most one borderline flip
    # from accumulation-order differences.
    assert abs(float(acc) - float(acc_ref)) <= 100.0 / (2 * B) + 1e-3, (acc, acc_ref)

    print("KERNEL_OK")
</pallas_src>

<mosaic_0001>
module attributes {stable_mosaic.version = 11 : i64} {
  func.func @_cdan_kernel(%arg0: i32, %arg1: i32, %arg2: memref<1x1xf32, #tpu.memory_space<smem>>, %arg3: memref<1x1xf32, #tpu.memory_space<smem>>, %arg4: memref<64x4xf32, #tpu.memory_space<vmem>>, %arg5: memref<64x128xbf16, #tpu.memory_space<vmem>>, %arg6: memref<64x1xf32, #tpu.memory_space<vmem>>, %arg7: memref<128x512xbf16, #tpu.memory_space<vmem>>, %arg8: memref<1x128xf32, #tpu.memory_space<vmem>>, %arg9: memref<1x128xf32, #tpu.memory_space<vmem>>, %arg10: memref<1x1xf32, #tpu.memory_space<vmem>>, %arg11: memref<1x1xf32, #tpu.memory_space<vmem>>, %arg12: memref<64x512xf32, #tpu.memory_space<vmem>>) attributes {dimension_semantics = [#tpu.dimension_semantics<arbitrary>, #tpu.dimension_semantics<arbitrary>], iteration_bounds = array<i64: 2, 2>, scalar_prefetch = 0 : i64, scratch_operands = 1 : i64, tpu.core_type = #tpu.core_type<tc>, window_params = [{transform_indices = @transform_0, window_bounds = array<i64: 1, 1>}, {transform_indices = @transform_1, window_bounds = array<i64: 1, 1>}, {transform_indices = @transform_2, window_bounds = array<i64: 64, 4>}, {transform_indices = @transform_3, window_bounds = array<i64: 64, 128>}, {transform_indices = @transform_4, window_bounds = array<i64: 64, 1>}, {transform_indices = @transform_5, window_bounds = array<i64: 128, 512>}, {pipeline_mode = #tpu.pipeline_mode<synchronous>, transform_indices = @transform_6, window_bounds = array<i64: 1, 128>}, {pipeline_mode = #tpu.pipeline_mode<synchronous>, transform_indices = @transform_7, window_bounds = array<i64: 1, 128>}, {pipeline_mode = #tpu.pipeline_mode<synchronous>, transform_indices = @transform_8, window_bounds = array<i64: 1, 1>}, {pipeline_mode = #tpu.pipeline_mode<synchronous>, transform_indices = @transform_9, window_bounds = array<i64: 1, 1>}]} {
    %c0_i32 = arith.constant 0 : i32
    %0 = arith.cmpi eq, %arg0, %c0_i32 : i32
    %c0_i32_0 = arith.constant 0 : i32
    %1 = arith.cmpi eq, %arg1, %c0_i32_0 : i32
    %2 = arith.andi %0, %1 : i1
    %3 = arith.extui %2 : i1 to i32
    %c0_i32_1 = arith.constant 0 : i32
    %4 = arith.cmpi ne, %3, %c0_i32_1 : i32
    scf.if %4 {
      %cst_12 = arith.constant 0.000000e+00 : f32
      %17 = vector.broadcast %cst_12 : f32 to vector<1x1xf32>
      %c0_13 = arith.constant 0 : index
      %c0_14 = arith.constant 0 : index
      %18 = vector.load %arg10[%c0_13, %c0_14] : memref<1x1xf32, #tpu.memory_space<vmem>>, vector<1x1xf32>
      tpu.vector_store %arg10[%c0_13, %c0_14], %17 {strides = array<i32>} : memref<1x1xf32, #tpu.memory_space<vmem>>, vector<1x1xf32>,
      %cst_15 = arith.constant 0.000000e+00 : f32
      %19 = vector.broadcast %cst_15 : f32 to vector<1x1xf32>
      %c0_16 = arith.constant 0 : index
      %c0_17 = arith.constant 0 : index
      %20 = vector.load %arg11[%c0_16, %c0_17] : memref<1x1xf32, #tpu.memory_space<vmem>>, vector<1x1xf32>
      tpu.vector_store %arg11[%c0_16, %c0_17], %19 {strides = array<i32>} : memref<1x1xf32, #tpu.memory_space<vmem>>, vector<1x1xf32>,
    } else {
    }
    %c0_i32_2 = arith.constant 0 : i32
    %5 = arith.cmpi eq, %arg1, %c0_i32_2 : i32
    %6 = arith.extui %5 : i1 to i32
    %c0_i32_3 = arith.constant 0 : i32
    %7 = arith.cmpi ne, %6, %c0_i32_3 : i32
    scf.if %7 {
      %cst_12 = arith.constant 0.000000e+00 : f32
      %17 = vector.broadcast %cst_12 : f32 to vector<64x512xf32>
      %c0_13 = arith.constant 0 : index
      %c0_14 = arith.constant 0 : index
      %18 = vector.load %arg12[%c0_13, %c0_14] : memref<64x512xf32, #tpu.memory_space<vmem>>, vector<64x512xf32>
      tpu.vector_store %arg12[%c0_13, %c0_14], %17 {strides = array<i32>} : memref<64x512xf32, #tpu.memory_space<vmem>>, vector<64x512xf32>,
    } else {
    }
    %c0 = arith.constant 0 : index
    %c0_4 = arith.constant 0 : index
    %8 = vector.load %arg12[%c0, %c0_4] : memref<64x512xf32, #tpu.memory_space<vmem>>, vector<64x512xf32>
    %c0_5 = arith.constant 0 : index
    %c0_6 = arith.constant 0 : index
    %9 = vector.load %arg5[%c0_5, %c0_6] : memref<64x128xbf16, #tpu.memory_space<vmem>>, vector<64x128xbf16>
    %c0_7 = arith.constant 0 : index
    %c0_8 = arith.constant 0 : index
    %10 = vector.load %arg7[%c0_7, %c0_8] : memref<128x512xbf16, #tpu.memory_space<vmem>>, vector<128x512xbf16>
    %cst = arith.constant dense<0.000000e+00> : vector<64x512xf32>
    %11 = tpu.matmul %9, %10, %cst {dimension_numbers = #tpu.dot_dimension_numbers<[1], [0], [0], [1], [0, 0, 1, 1], [], []>} : vector<64x128xbf16>, vector<128x512xbf16>, vector<64x512xf32> -> vector<64x512xf32>
    %12 = arith.addf %8, %11 : vector<64x512xf32>
    %c0_9 = arith.constant 0 : index
    %c0_10 = arith.constant 0 : index
    %13 = vector.load %arg12[%c0_9, %c0_10] : memref<64x512xf32, #tpu.memory_space<vmem>>, vector<64x512xf32>
    tpu.vector_store %arg12[%c0_9, %c0_10], %12 {strides = array<i32>} : memref<64x512xf32, #tpu.memory_space<vmem>>, vector<64x512xf32>,
    %c1_i32 = arith.constant 1 : i32
    %14 = arith.cmpi eq, %arg1, %c1_i32 : i32
    %15 = arith.extui %14 : i1 to i32
    %c0_i32_11 = arith.constant 0 : i32
    %16 = arith.cmpi ne, %15, %c0_i32_11 : i32
    scf.if %16 {
      %c0_12 = arith.constant 0 : index
      %c0_13 = arith.constant 0 : index
      %17 = vector.load %arg4[%c0_12, %c0_13] : memref<64x4xf32, #tpu.memory_space<vmem>>, vector<64x4xf32>
      %c0_14 = arith.constant 0 : index
      %c0_15 = arith.constant 0 : index
      %18 = memref.load %arg2[%c0_14, %c0_15] : memref<1x1xf32, #tpu.memory_space<smem>>
      %19 = vector.broadcast %18 : f32 to vector<64x4xf32>
      %20 = arith.subf %17, %19 : vector<64x4xf32>
      %cst_16 = arith.constant dense<0xFF800000> : vector<64xf32>
      %21 = vector.multi_reduction <maximumf>, %20, %cst_16 [1] : vector<64x4xf32> to vector<64xf32>
      %22 = vector.shape_cast %21 : vector<64xf32> to vector<64x1xf32>
      %cst_17 = arith.constant 1.200000e+01 : f32
      %23 = vector.broadcast %cst_17 : f32 to vector<64x4xf32>
      %24 = arith.mulf %23, %20 : vector<64x4xf32>
      %cst_18 = arith.constant 1.000000e-30 : f32
      %25 = vector.broadcast %cst_18 : f32 to vector<64x1xf32>
      %26 = arith.maximumf %22, %25 : vector<64x1xf32>
      %27 = vector.broadcast %26 : vector<64x1xf32> to vector<64x4xf32>
      %28 = arith.divf %24, %27 : vector<64x4xf32>
      %29 = math.exp %28 : vector<64x4xf32>
      %cst_19 = arith.constant dense<0.000000e+00> : vector<64xf32>
      %30 = vector.multi_reduction <add>, %29, %cst_19 [1] : vector<64x4xf32> to vector<64xf32>
      %31 = vector.shape_cast %30 : vector<64xf32> to vector<64x1xf32>
      %32 = vector.broadcast %31 : vector<64x1xf32> to vector<64x4xf32>
      %33 = arith.divf %29, %32 : vector<64x4xf32>
      %c0_20 = arith.constant 0 : index
      %c0_21 = arith.constant 0 : index
      %34 = vector.load %arg12[%c0_20, %c0_21] : memref<64x512xf32, #tpu.memory_space<vmem>>, vector<64x512xf32>
      %35 = vector.extract_strided_slice %33 {offsets = [0, 0], sizes = [64, 1], strides = [1, 1]} : vector<64x4xf32> to vector<64x1xf32>
      %36 = vector.extract_strided_slice %34 {offsets = [0, 0], sizes = [64, 128], strides = [1, 1]} : vector<64x512xf32> to vector<64x128xf32>
      %37 = vector.broadcast %35 : vector<64x1xf32> to vector<64x128xf32>
      %38 = arith.mulf %37, %36 : vector<64x128xf32>
      %39 = vector.extract_strided_slice %33 {offsets = [0, 1], sizes = [64, 1], strides = [1, 1]} : vector<64x4xf32> to vector<64x1xf32>
      %40 = vector.extract_strided_slice %34 {offsets = [0, 128], sizes = [64, 128], strides = [1, 1]} : vector<64x512xf32> to vector<64x128xf32>
      %41 = vector.broadcast %39 : vector<64x1xf32> to vector<64x128xf32>
      %42 = arith.mulf %41, %40 : vector<64x128xf32>
      %43 = arith.addf %38, %42 : vector<64x128xf32>
      %44 = vector.extract_strided_slice %33 {offsets = [0, 2], sizes = [64, 1], strides = [1, 1]} : vector<64x4xf32> to vector<64x1xf32>
      %45 = vector.extract_strided_slice %34 {offsets = [0, 256], sizes = [64, 128], strides = [1, 1]} : vector<64x512xf32> to vector<64x128xf32>
      %46 = vector.broadcast %44 : vector<64x1xf32> to vector<64x128xf32>
      %47 = arith.mulf %46, %45 : vector<64x128xf32>
      %48 = arith.addf %43, %47 : vector<64x128xf32>
      %49 = vector.extract_strided_slice %33 {offsets = [0, 3], sizes = [64, 1], strides = [1, 1]} : vector<64x4xf32> to vector<64x1xf32>
      %50 = vector.extract_strided_slice %34 {offsets = [0, 384], sizes = [64, 128], strides = [1, 1]} : vector<64x512xf32> to vector<64x128xf32>
      %51 = vector.broadcast %49 : vector<64x1xf32> to vector<64x128xf32>
      %52 = arith.mulf %51, %50 : vector<64x128xf32>
      %53 = arith.addf %48, %52 : vector<64x128xf32>
      %c0_22 = arith.constant 0 : index
      %c0_23 = arith.constant 0 : index
      %54 = vector.load %arg8[%c0_22, %c0_23] : memref<1x128xf32, #tpu.memory_space<vmem>>, vector<1x128xf32>
      %55 = vector.broadcast %54 : vector<1x128xf32> to vector<64x128xf32>
      %56 = arith.addf %53, %55 : vector<64x128xf32>
      %cst_24 = arith.constant 0.000000e+00 : f32
      %57 = vector.broadcast %cst_24 : f32 to vector<64x128xf32>
      %58 = arith.maximumf %56, %57 : vector<64x128xf32>
      %c0_25 = arith.constant 0 : index
      %c0_26 = arith.constant 0 : index
      %59 = vector.load %arg9[%c0_25, %c0_26] : memref<1x128xf32, #tpu.memory_space<vmem>>, vector<1x128xf32>
      %60 = vector.broadcast %59 : vector<1x128xf32> to vector<64x128xf32>
      %61 = arith.mulf %58, %60 : vector<64x128xf32>
      %cst_27 = arith.constant dense<0.000000e+00> : vector<64xf32>
      %62 = vector.multi_reduction <add>, %61, %cst_27 [1] : vector<64x128xf32> to vector<64xf32>
      %63 = vector.shape_cast %62 : vector<64xf32> to vector<64x1xf32>
      %c0_28 = arith.constant 0 : index
      %c0_29 = arith.constant 0 : index
      %64 = memref.load %arg3[%c0_28, %c0_29] : memref<1x1xf32, #tpu.memory_space<smem>>
      %65 = vector.broadcast %64 : f32 to vector<64x1xf32>
      %66 = arith.addf %63, %65 : vector<64x1xf32>
      %c64_i32 = arith.constant 64 : i32
      %67 = arith.muli %arg0, %c64_i32 : i32
      %68 = tpu.iota {dimensions = array<i32: 0>} : vector<64x1xi32>
      %69 = vector.broadcast %67 : i32 to vector<64x1xi32>
      %70 = arith.addi %69, %68 : vector<64x1xi32>
      %c64_i32_30 = arith.constant 64 : i32
      %71 = vector.broadcast %c64_i32_30 : i32 to vector<64x1xi32>
      %72 = arith.cmpi slt, %70, %71 : vector<64x1xi32>
      %73 = arith.extui %72 : vector<64x1xi1> to vector<64x1xi32>
      %74 = arith.sitofp %73 : vector<64x1xi32> to vector<64x1xf32>
      %cst_31 = arith.constant dense<0xFF800000> : vector<64xf32>
      %75 = vector.multi_reduction <maximumf>, %17, %cst_31 [1] : vector<64x4xf32> to vector<64xf32>
      %76 = vector.shape_cast %75 : vector<64xf32> to vector<64x1xf32>
      %cst_32 = arith.constant dense<true> : vector<64x1xi1>
      %77 = arith.xori %72, %cst_32 : vector<64x1xi1>
      %cst_33 = arith.constant -2.300000e+02 : f32
      %78 = vector.broadcast %cst_33 : f32 to vector<64x1xf32>
      %79 = arith.cmpf olt, %76, %78 : vector<64x1xf32>
      %80 = arith.andi %77, %79 : vector<64x1xi1>
      %c0_34 = arith.constant 0 : index
      %c0_35 = arith.constant 0 : index
      %81 = vector.load %arg6[%c0_34, %c0_35] : memref<64x1xf32, #tpu.memory_space<vmem>>, vector<64x1xf32>
      %cst_36 = arith.constant 0.000000e+00 : f32
      %82 = vector.broadcast %cst_36 : f32 to vector<64x1xf32>
      %83 = arith.select %80, %82, %81 : vector<64x1xi1>, vector<64x1xf32>
      %cst_37 = arith.constant 0.000000e+00 : f32
      %84 = vector.broadcast %cst_37 : f32 to vector<64x1xf32>
      %85 = arith.maximumf %66, %84 : vector<64x1xf32>
      %86 = math.absf %66 : vector<64x1xf32>
      %cst_38 = arith.constant 0.000000e+00 : f32
      %87 = vector.broadcast %cst_38 : f32 to vector<64x1xf32>
      %88 = arith.subf %87, %86 : vector<64x1xf32>
      %89 = math.exp %88 : vector<64x1xf32>
      %cst_39 = arith.constant 1.000000e+00 : f32
      %90 = vector.broadcast %cst_39 : f32 to vector<64x1xf32>
      %91 = arith.addf %90, %89 : vector<64x1xf32>
      %92 = math.log %91 : vector<64x1xf32>
      %93 = arith.addf %85, %92 : vector<64x1xf32>
      %94 = arith.mulf %74, %66 : vector<64x1xf32>
      %95 = arith.subf %93, %94 : vector<64x1xf32>
      %96 = arith.mulf %83, %95 : vector<64x1xf32>
      %97 = vector.shape_cast %96 : vector<64x1xf32> to vector<1x64x1xf32>
      %cst_40 = arith.constant dense<0.000000e+00> : vector<1xf32>
      %98 = vector.multi_reduction <add>, %97, %cst_40 [1, 2] : vector<1x64x1xf32> to vector<1xf32>
      %99 = vector.shape_cast %98 : vector<1xf32> to vector<1x1x1xf32>
      %100 = vector.extract %99[0, 0, 0] : f32 from vector<1x1x1xf32>
      %101 = vector.broadcast %100 : f32 to vector<1x1xf32>
      %cst_41 = arith.constant 0.000000e+00 : f32
      %102 = vector.broadcast %cst_41 : f32 to vector<64x1xf32>
      %103 = arith.cmpf oge, %66, %102 : vector<64x1xf32>
      %104 = arith.xori %103, %72 : vector<64x1xi1>
      %cst_42 = arith.constant dense<true> : vector<64x1xi1>
      %105 = arith.xori %104, %cst_42 : vector<64x1xi1>
      %106 = arith.extui %105 : vector<64x1xi1> to vector<64x1xi32>
      %107 = arith.sitofp %106 : vector<64x1xi32> to vector<64x1xf32>
      %108 = vector.shape_cast %107 : vector<64x1xf32> to vector<1x64x1xf32>
      %cst_43 = arith.constant dense<0.000000e+00> : vector<1xf32>
      %109 = vector.multi_reduction <add>, %108, %cst_43 [1, 2] : vector<1x64x1xf32> to vector<1xf32>
      %110 = vector.shape_cast %109 : vector<1xf32> to vector<1x1x1xf32>
      %111 = vector.extract %110[0, 0, 0] : f32 from vector<1x1x1xf32>
      %112 = vector.broadcast %111 : f32 to vector<1x1xf32>
      %c0_44 = arith.constant 0 : index
      %c0_45 = arith.constant 0 : index
      %113 = vector.load %arg10[%c0_44, %c0_45] : memref<1x1xf32, #tpu.memory_space<vmem>>, vector<1x1xf32>
      %cst_46 = arith.constant 7.812500e-03 : f32
      %114 = vector.broadcast %cst_46 : f32 to vector<1x1xf32>
      %115 = arith.mulf %101, %114 : vector<1x1xf32>
      %116 = arith.addf %113, %115 : vector<1x1xf32>
      %c0_47 = arith.constant 0 : index
      %c0_48 = arith.constant 0 : index
      %117 = vector.load %arg10[%c0_47, %c0_48] : memref<1x1xf32, #tpu.memory_space<vmem>>, vector<1x1xf32>
      tpu.vector_store %arg10[%c0_47, %c0_48], %116 {strides = array<i32>} : memref<1x1xf32, #tpu.memory_space<vmem>>, vector<1x1xf32>,
      %c0_49 = arith.constant 0 : index
      %c0_50 = arith.constant 0 : index
      %118 = vector.load %arg11[%c0_49, %c0_50] : memref<1x1xf32, #tpu.memory_space<vmem>>, vector<1x1xf32>
      %cst_51 = arith.constant 7.812500e-01 : f32
      %119 = vector.broadcast %cst_51 : f32 to vector<1x1xf32>
      %120 = arith.mulf %112, %119 : vector<1x1xf32>
      %121 = arith.addf %118, %120 : vector<1x1xf32>
      %c0_52 = arith.constant 0 : index
      %c0_53 = arith.constant 0 : index
      %122 = vector.load %arg11[%c0_52, %c0_53] : memref<1x1xf32, #tpu.memory_space<vmem>>, vector<1x1xf32>
      tpu.vector_store %arg11[%c0_52, %c0_53], %121 {strides = array<i32>} : memref<1x1xf32, #tpu.memory_space<vmem>>, vector<1x1xf32>,
    } else {
    }
    return
  }
  func.func @transform_0(%arg0: i32, %arg1: i32) -> (i32, i32) {
    %c0_i32 = arith.constant 0 : i32
    %c0_i32_0 = arith.constant 0 : i32
    %c0_i32_1 = arith.constant 0 : i32
    return %c0_i32, %c0_i32_0 : i32, i32
  }
  func.func @transform_1(%arg0: i32, %arg1: i32) -> (i32, i32) {
    %c0_i32 = arith.constant 0 : i32
    %c0_i32_0 = arith.constant 0 : i32
    %c0_i32_1 = arith.constant 0 : i32
    return %c0_i32, %c0_i32_0 : i32, i32
  }
  func.func @transform_2(%arg0: i32, %arg1: i32) -> (i32, i32) {
    %c0_i32 = arith.constant 0 : i32
    %c0_i32_0 = arith.constant 0 : i32
    return %arg0, %c0_i32 : i32, i32
  }
  func.func @transform_3(%arg0: i32, %arg1: i32) -> (i32, i32) {
    %c0_i32 = arith.constant 0 : i32
    return %arg0, %arg1 : i32, i32
  }
  func.func @transform_4(%arg0: i32, %arg1: i32) -> (i32, i32) {
    %c0_i32 = arith.constant 0 : i32
    %c0_i32_0 = arith.constant 0 : i32
    return %arg0, %c0_i32 : i32, i32
  }
  func.func @transform_5(%arg0: i32, %arg1: i32) -> (i32, i32) {
    %c0_i32 = arith.constant 0 : i32
    %c0_i32_0 = arith.constant 0 : i32
    return %arg1, %c0_i32 : i32, i32
  }
  func.func @transform_6(%arg0: i32, %arg1: i32) -> (i32, i32) {
    %c0_i32 = arith.constant 0 : i32
    %c0_i32_0 = arith.constant 0 : i32
    %c0_i32_1 = arith.constant 0 : i32
    return %c0_i32, %c0_i32_0 : i32, i32
  }
  func.func @transform_7(%arg0: i32, %arg1: i32) -> (i32, i32) {
    %c0_i32 = arith.constant 0 : i32
    %c0_i32_0 = arith.constant 0 : i32
    %c0_i32_1 = arith.constant 0 : i32
    return %c0_i32, %c0_i32_0 : i32, i32
  }
  func.func @transform_8(%arg0: i32, %arg1: i32) -> (i32, i32) {
    %c0_i32 = arith.constant 0 : i32
    %c0_i32_0 = arith.constant 0 : i32
    %c0_i32_1 = arith.constant 0 : i32
    return %c0_i32, %c0_i32_0 : i32, i32
  }
  func.func @transform_9(%arg0: i32, %arg1: i32) -> (i32, i32) {
    %c0_i32 = arith.constant 0 : i32
    %c0_i32_0 = arith.constant 0 : i32
    %c0_i32_1 = arith.constant 0 : i32
    return %c0_i32, %c0_i32_0 : i32, i32
  }
}

</mosaic_0001>

<bundles_post_ra>
// kernel: tpu_custom_call.1
= control target key start
LH: loop header
LB: loop body
LE: loop exit
PB: predicated region body
PF: predicated region fallthrough
CT: control target
= control target key end

     0   :  { %s3173_s0 = inlined_call_operand.<no memory space> [shape: f32[1,1], index: 0, kind: input, shape index: {}]   ;;  %s3174_s1 = inlined_call_operand.<no memory space> [shape: f32[1,1], index: 1, kind: input, shape index: {}]   ;;  %s3175_s2 = inlined_call_operand.vmem [shape: f32[128,4], index: 2, kind: input, shape index: {}]   ;;  %s3176_s3 = inlined_call_operand.vmem [shape: bf16[128,256], index: 3, kind: input, shape index: {}]   ;;  %s3177_s4 = inlined_call_operand.vmem [shape: f32[128,1], index: 4, kind: input, shape index: {}]   ;;  %s3178_s5 = inlined_call_operand.hbm [shape: bf16[256,512], index: 5, kind: input, shape index: {}]   ;;  %s3179_s6 = inlined_call_operand.vmem [shape: f32[1,128], index: 6, kind: input, shape index: {}]   ;;  %s3180_s7 = inlined_call_operand.vmem [shape: f32[1,128], index: 7, kind: input, shape index: {}]   ;;  %s3181_s8 = inlined_call_operand.hbm [shape: f32[1,1], index: 8, kind: output, shape index: {0}]   ;;  %s3182_s9 = inlined_call_operand.hbm [shape: f32[1,1], index: 9, kind: output, shape index: {1}]  }
   0x1   :  { %3187 = sst [smem:[#allocation18_spill]] %s3176_s3 }
   0x2   :  { %15 = sst [smem:[#allocation3]] %s3173_s0 }
   0x3   :  { %16 = sst [smem:[#allocation4]] %s3174_s1 }
   0x4   :  { %17 = vsyncpa [#allocation7], 0 }
   0x5   :  { %19 = vsyncpa [#allocation7 + $0x1], 0 }
   0x6   :  { %20 = vsyncpa [#allocation8], 0 }
   0x7   :  { %21 = vsyncpa [#allocation11], 0  ;;  %s2464_s13 = smov 0   ;;  %s2466_s14 = smov 0  }
   0x8   :  { %s2468_s15 = smov 0   ;;  %s2470_s16 = smov 0  }
   0x9   :  { %s2472_s17 = smov 0   ;;  %s2474_s18 = smov 0  }
   0xa   :  { %s2476_s0 = smov 0   ;;  %s2478_s19 = smov 0  }
   0xb   :  { %s2480_s1 = smov 0   ;;  %s2482_s20 = smov 0  }
   0xc LB: > { %3188 = sst [smem:[#allocation15_spill]] %s2388_s1  ;;  %s3183_s21 = sadd.s32 4294967295, %s2392_s20   ;;  %s2392_s20 = sphi %s2482_s20, %s27_s20   ;;  %s2388_s1 = sphi %s2480_s1, %s3225_s1   ;;  %s2384_s19 = sphi %s2478_s19, %s3232_s19   ;;  %s2380_s0 = sphi %s2476_s0, %s3223_s0   ;;  %s2376_s18 = sphi %s2474_s18, %s3231_s18   ;;  %s2372_s17 = sphi %s2472_s17, %s3230_s17   ;;  %s2368_s16 = sphi %s2470_s16, %s3229_s16   ;;  %s2364_s15 = sphi %s2468_s15, %s3228_s15   ;;  %s2360_s14 = sphi %s2466_s14, %s3227_s14   ;;  %s2356_s13 = sphi %s2464_s13, %s3226_s13  }
   0xd   : > { %s36_s22 = sadd.s32 1, %s2384_s19  ;;  %s39_s23 = sadd.s32 1, %s2388_s1 }
   0xe   : > { %p37_p0 = scmp.ge.s32.totalorder %s36_s22, 2  ;;  %s116_s24 = sadd.s32 1, %s2372_s17 }
   0xf   : > { %p123_p1 = scmp.ne.s32.totalorder %s2372_s17, %s2368_s16  ;;  %p124_p2 = scmp.eq.s32.totalorder %s2392_s20, 0 }
  0x10   : > { %s3234_s22 = smov (%p37_p0, %s36_s22), 0  ;;  %s3236_s23 = smov (!%p37_p0, %s39_s23), %s2388_s1 }
  0x11   : > { %3189 = sst [smem:[#allocation16_spill]] %s3234_s22  ;;  %s112_s25 = ssub.s32 %s2384_s19, %s3234_s22 }
  0x12   : > { %p41_p3 = scmp.ge.s32.totalorder %s3236_s23, 2  ;;  %p166_p4 = scmp.eq.s32.totalorder %s112_s25, 0 }
  0x13   : > { %p2526_p5 = por %p124_p2, %p123_p1  ;;  %s168_s27 = sadd.s32 1, %s2364_s15 }
  0x14   : > { %s3238_s23 = smov (%p41_p3, %s3236_s23), 0  ;;  %p175_p6 = scmp.ne.s32.totalorder %s2364_s15, %s2360_s14 }
  0x15   : > { %3191 = sst [smem:[#allocation17_spill]] %s3238_s23  ;;  %s111_s29 = ssub.s32 %s2388_s1, %s3238_s23 }
  0x16   : > { %s2534_s28 = scalar_select %p166_p4, %s2364_s15, %s168_s27  }
  0x17   : > { %s113_s30 = sor.u32 %s112_s25, %s111_s29  ;;  %p181_p7 = scmp.ne.s32.totalorder %s2360_s14, %s2356_s13 }
  0x18   : > { %p114_p8 = scmp.eq.s32.totalorder %s113_s30, 0  ;;  %p2542_p9 = por %p175_p6, %p124_p2 }
  0x19   : > { %p182_p10 = scmp.eq.s32.totalorder %s3183_s21, 0  ;;  %p1867_p12 = scmp.ge.s32.totalorder %s2392_s20, 4 }
  0x1a   : > { %s2549_s11 = scalar_select %p114_p8, %s2372_s17, %s116_s24  }
  0x1b   : > { %p2551_p11 = por %p182_p10, %p181_p7  ;;  %297 = sbr.rel (%p1867_p12) target bundleno = 75 (0x4b), region = 32 }
  0x22   : > { %309 = sbr.rel (!%p2526_p5) target bundleno = 49 (0x31), region = 40  ;;  %s311_s13 = sand.u32 (%p2526_p5), 1, %s2372_s17  }
  0x23   : > { %s1946_s25 = sshll.u32 (%p2526_p5), %s2388_s1, 4  ;;  %s1868_s27 = sshll.u32 (%p2526_p5), %s311_s13, 5 }
  0x24   : > { %s316_s29 = sadd.s32 (%p2526_p5), %s2384_s19, %s1946_s25  ;;  %s3194_s3 = sld [smem:[#allocation18_spill]] (%p2526_p5) }
  0x25   : > { %s1871_s30 = sshll.u32 (%p2526_p5), %s316_s29, 2  ;;  %s313_s22 = scalar_lea.vmem (%p2526_p5), [#allocation5], %s1868_s27 }
  0x2a   : > { %s318_s23 = scalar_lea.vmem %s3194_s3, %s1871_s30 }
  0x2b   : > { %v334_v0 = vld [vmem:[%s318_s23] sm:$0xf]  ;;  %v336_v1 = vld [vmem:[%s318_s23 + $0x8] sm:$0xf]  ;;  %v338_v2 = vld [vmem:[%s318_s23 + $0x10] sm:$0xf] }
  0x2c   : > { %335 = vst [vmem:[%s313_s22] sm:$0xf] %v334_v0  ;;  %337 = vst [vmem:[%s313_s22 + $0x4] sm:$0xf] %v336_v1  ;;  %v340_v3 = vld [vmem:[%s318_s23 + $0x18] sm:$0xf] }
  0x2d   : > { %339 = vst [vmem:[%s313_s22 + $0x8] sm:$0xf] %v338_v2  ;;  %v342_v4 = vld [vmem:[%s318_s23 + $0x20] sm:$0xf]  ;;  %v344_v5 = vld [vmem:[%s318_s23 + $0x28] sm:$0xf] }
  0x2e   : > { %341 = vst [vmem:[%s313_s22 + $0xc] sm:$0xf] %v340_v3  ;;  %343 = vst [vmem:[%s313_s22 + $0x10] sm:$0xf] %v342_v4  ;;  %v346_v6 = vld [vmem:[%s318_s23 + $0x30] sm:$0xf] }
  0x2f   : > { %345 = vst [vmem:[%s313_s22 + $0x14] sm:$0xf] %v344_v5  ;;  %v348_v7 = vld [vmem:[%s318_s23 + $0x38] sm:$0xf]  ;;  %347 = vst [vmem:[%s313_s22 + $0x18] sm:$0xf] %v346_v6 }
  0x30   : > { %349 = vst [vmem:[%s313_s22 + $0x1c] sm:$0xf] %v348_v7 }
  0x31 PF: > { %s398_s21 = sand.u32 1, %s2364_s15   ;;  %s1948_s26 = sshll.u32 %s2384_s19, 12 }
  0x32   : > { %s1872_s13 = sshll.u32 %s398_s21, 8  ;;  %s2569_s29 = scalar_lea.hbm %s3178_s5, %s1948_s26 }
  0x33   : > { %s402_s30 = scalar_lea.vmem [#allocation6], %s1872_s13  ;;  %s2573_s22 = scalar_lea.sflag [#allocation7], %s398_s21 }
  0x34   : > { %s410_s23 = sshll.u32 %s402_s30, 4  ;;  %s2222_s24 = scalar_lea.hbm %s2569_s29, 4096  ;;  %s2571_s23 = int_to_ptr.vmem [resolvable:$true] %s410_s23 }
  0x35   : > { %p2223_p13 = scmp.ne.s32.totalorder %s2569_s29, %s2222_s24  ;;  %s2226_s26 = scalar_lea.hbm %s3178_s5, 8192 }
  0x36   : > { %p2227_p2 = scmp.lt.u32.totalorder %s2569_s29, %s3178_s5  ;;  %p2228_p3 = scmp.lt.u32.totalorder %s2226_s26, %s2222_s24 }
  0x37   : > { %p2224_p0 = pnand %p2223_p13, %p2542_p9  ;;  %p2230_p5 = scmp.lt.u32.totalorder %s2222_s24, %s2569_s29 }
  0x38   : > { %p2229_p4 = por %p2228_p3, %p2227_p2 }
  0x39   : > { %p2225_p1 = pneg %p2224_p0 }
  0x3a   : > { %p2231_p6 = por %p2230_p5, %p2229_p4 }
  0x3c   : > { %p2232_p7 = pnand %p2231_p6, %p2225_p1 }
  0x3e   : > { %2235 = shalt.err (!%p2232_p7)
}
  0x3f   : > { %s2236_s21 = scalar_lea.vmem %s2571_s23, 4096  ;;  %s2394_s3 = smov [#allocation6]  }
  0x40   : > { %p2237_p8 = scmp.ne.s32.totalorder %s2571_s23, %s2236_s21  ;;  %s2240_s1 = sshll.u32 %s2394_s3, 4  ;;  %s2241_s1 = int_to_ptr.vmem [resolvable:$false] %s2240_s1 }
  0x41   : > { %s2242_s13 = scalar_lea.vmem %s2241_s1, 8192  ;;  %p2243_p13 = scmp.lt.s32.totalorder %s2571_s23, %s2241_s1 }
  0x42   : > { %p2238_p10 = pnand %p2237_p8, %p2542_p9  ;;  %p2244_p0 = scmp.lt.s32.totalorder %s2242_s13, %s2236_s21 }
  0x44   : > { %p2239_p12 = pneg %p2238_p10  ;;  %p2245_p2 = por %p2244_p0, %p2243_p13 }
  0x46   : > { %p2246_p3 = pnand %p2245_p2, %p2239_p12 }
  0x48   : > { %2249 = shalt.err (!%p2246_p3)
}
  0x49   : > { %s2395_s30 = smov 256   ;;  %s2396_s24 = smov 16  }
  0x4a   : > { %1953 = dma.hbm_to_vmem [thread:$0]  (%p2542_p9), %s2569_s29, 4096, %s2571_s23, %s2573_s22, %s2395_s30, %s2395_s30, %s2396_s24  }
  0x4b PF: > { %p1876_p1 = scmp.ge.s32.totalorder %s2392_s20, 1  ;;  %p418_p4 = scmp.lt.s32.totalorder %s2392_s20, 5 }
  0x4d   : > { %p419_p5 = pnand %p1876_p1, %p418_p4 }
  0x4e   : > { %s425_s26 = sand.u32 (!%p419_p5), 1, %s2368_s16   ;;  %s431_s25 = sand.u32 (!%p419_p5), 1, %s2360_s14  }
  0x4f   : > { %422 = sbr.rel (%p419_p5) target bundleno = 1399 (0x577), region = 89  ;;  %s1877_s27 = sshll.u32 (!%p419_p5), %s425_s26, 5 }
  0x50   : > { %s1878_s21 = sshll.u32 (!%p419_p5), %s431_s25, 8  ;;  %s2601_s3 = scalar_lea.vmem (!%p419_p5), [#allocation5], %s1877_s27 }
  0x51   : > { %s432_s1 = scalar_lea.sflag (!%p419_p5), [#allocation7], %s431_s25  ;;  %s2603_s13 = scalar_lea.vmem (!%p419_p5), [#allocation6], %s1878_s21 }
  0x56   : > { %2343 = dma.done.wait (%p2551_p11), %s432_s1, 4096  }
  0x57   : > { %2345 = vsyncadd (%p2551_p11), %s432_s1, 4294963200  ;;  %s1879_s10 = sshll.u32 %s2380_s0, 3  ;;  %p494_p9 = scmp.eq.s32.totalorder %s2380_s0, 0 }
  0x58   : > { %p480_p6 = scmp.lt.s32.totalorder %s1879_s10, 15  ;;  %p495_p7 = scmp.eq.s32.totalorder %s2376_s18, 0 }
  0x5a   : > { %s3240_s10 = smov (!%p480_p6, %s1879_s10), 15  ;;  %p496_p8 = pnand %p495_p7, %p494_p9 }
  0x5b   : > { %s1880_s16 = sshll.u32 %s3240_s10, 3  ;;  %vm500_vm0 = vcmask (!%p496_p8), 0   ;;  %v2397_v8 = vmov (!%p496_p8), 0.0  }
  0x5c   : > { %s2615_s22 = scalar_lea.vmem %s3175_s2, %s1880_s16  ;;  %s2620_s12 = scalar_lea.vmem %s3177_s4, %s1880_s16  ;;  %501 = vst.msk [vmem:[#allocation9] sm:$0x1] (!%p496_p8), %vm500_vm0, %v2397_v8  ;;  %502 = vst.msk [vmem:[#allocation10] sm:$0x1] (!%p496_p8), %vm500_vm0, %v2397_v8 }
  0x5d   : > { %499 = sbr.rel (%p496_p8) target bundleno = 100 (0x64), region = 101 }
  0x64 PF: > { %p1883_p11 = scmp.ne.s32.totalorder %s2376_s18, 0 }
  0x65   : > { %v2398_v9 = vmov (!%p1883_p11), 0.0  }
  0x66   : > { %505 = sbr.rel (%p1883_p11) target bundleno = 118 (0x76), region = 105  ;;  %506 = vst [vmem:[#allocation2] sm:$0xff] (!%p1883_p11), %v2398_v9  ;;  %507 = vst [vmem:[#allocation2 + $0x8] sm:$0xff] (!%p1883_p11), %v2398_v9 }
  0x67   : > { %508 = vst [vmem:[#allocation2 + $0x10] sm:$0xff] (!%p1883_p11), %v2398_v9  ;;  %509 = vst [vmem:[#allocation2 + $0x18] sm:$0xff] (!%p1883_p11), %v2398_v9 }
  0x68   : > { %510 = vst [vmem:[#allocation2 + $0x20] sm:$0xff] (!%p1883_p11), %v2398_v9  ;;  %511 = vst [vmem:[#allocation2 + $0x28] sm:$0xff] (!%p1883_p11), %v2398_v9 }
  0x69   : > { %512 = vst [vmem:[#allocation2 + $0x30] sm:$0xff] (!%p1883_p11), %v2398_v9  ;;  %513 = vst [vmem:[#allocation2 + $0x38] sm:$0xff] (!%p1883_p11), %v2398_v9 }
  0x6a   : > { %514 = vst [vmem:[#allocation2 + $0x40] sm:$0xff] (!%p1883_p11), %v2398_v9  ;;  %515 = vst [vmem:[#allocation2 + $0x48] sm:$0xff] (!%p1883_p11), %v2398_v9 }
  0x6b   : > { %516 = vst [vmem:[#allocation2 + $0x50] sm:$0xff] (!%p1883_p11), %v2398_v9  ;;  %517 = vst [vmem:[#allocation2 + $0x58] sm:$0xff] (!%p1883_p11), %v2398_v9 }
  0x6c   : > { %518 = vst [vmem:[#allocation2 + $0x60] sm:$0xff] (!%p1883_p11), %v2398_v9  ;;  %519 = vst [vmem:[#allocation2 + $0x68] sm:$0xff] (!%p1883_p11), %v2398_v9 }
  0x6d   : > { %520 = vst [vmem:[#allocation2 + $0x70] sm:$0xff] %v2398_v9  ;;  %521 = vst [vmem:[#allocation2 + $0x78] sm:$0xff] %v2398_v9 }
  0x6e   : > { %522 = vst [vmem:[#allocation2 + $0x80] sm:$0xff] %v2398_v9  ;;  %523 = vst [vmem:[#allocation2 + $0x88] sm:$0xff] %v2398_v9 }
  0x6f   : > { %524 = vst [vmem:[#allocation2 + $0x90] sm:$0xff] %v2398_v9  ;;  %525 = vst [vmem:[#allocation2 + $0x98] sm:$0xff] %v2398_v9 }
  0x70   : > { %526 = vst [vmem:[#allocation2 + $0xa0] sm:$0xff] %v2398_v9  ;;  %527 = vst [vmem:[#allocation2 + $0xa8] sm:$0xff] %v2398_v9 }
  0x71   : > { %528 = vst [vmem:[#allocation2 + $0xb0] sm:$0xff] %v2398_v9  ;;  %529 = vst [vmem:[#allocation2 + $0xb8] sm:$0xff] %v2398_v9 }
  0x72   : > { %530 = vst [vmem:[#allocation2 + $0xc0] sm:$0xff] %v2398_v9  ;;  %531 = vst [vmem:[#allocation2 + $0xc8] sm:$0xff] %v2398_v9 }
  0x73   : > { %532 = vst [vmem:[#allocation2 + $0xd0] sm:$0xff] %v2398_v9  ;;  %533 = vst [vmem:[#allocation2 + $0xd8] sm:$0xff] %v2398_v9 }
  0x74   : > { %534 = vst [vmem:[#allocation2 + $0xe0] sm:$0xff] %v2398_v9  ;;  %535 = vst [vmem:[#allocation2 + $0xe8] sm:$0xff] %v2398_v9 }
  0x75   : > { %536 = vst [vmem:[#allocation2 + $0xf0] sm:$0xff] %v2398_v9  ;;  %537 = vst [vmem:[#allocation2 + $0xf8] sm:$0xff] %v2398_v9 }
  0x76 PF: > { %v2060_v10 = vld [vmem:[%s2603_s13 + $0x4] ss:$16 sps:$4 sm:$0xff]   ;;  %v2062_v11 = vld [vmem:[%s2603_s13 + $0xc] ss:$16 sps:$4 sm:$0xff]   ;;  %v2399_v12 = vmov 0   ;;  %p1920_p10 = scmp.ne.s32.totalorder %s2376_s18, 1 }
  0x77   : > { %826 = vmatprep.mubr.bf16.mxu0 %v2399_v12  ;;  %899 = vmatprep.mubr.bf16.mxu1 %v2399_v12  ;;  %v2064_v13 = vld [vmem:[%s2603_s13] ss:$16 sps:$4 sm:$0xff]   ;;  %v2065_v14 = vld [vmem:[%s2603_s13 + $0x8] ss:$16 sps:$4 sm:$0xff]   ;;  %v2066_v15 = vld [vmem:[%s2603_s13 + $0x24] ss:$16 sps:$4 sm:$0xff]  }
  0x78   : > { %794 = vmatprep.subr.bf16.mxu0 %v2060_v10  ;;  %867 = vmatprep.subr.bf16.mxu1 %v2062_v11  ;;  %v2068_v16 = vld [vmem:[%s2603_s13 + $0x2c] ss:$16 sps:$4 sm:$0xff]   ;;  %v2070_v17 = vld [vmem:[%s2603_s13 + $0x20] ss:$16 sps:$4 sm:$0xff]   ;;  %v2071_v18 = vld [vmem:[%s2603_s13 + $0x28] ss:$16 sps:$4 sm:$0xff]  }
  0x79   : > { %795 = vmatpush1.bf16.msra.mxu0 %v2064_v13  ;;  %868 = vmatpush1.bf16.msra.mxu1 %v2065_v14  ;;  %v2072_v19 = vld [vmem:[%s2603_s13 + $0x44] ss:$16 sps:$4 sm:$0xff]   ;;  %v2074_v20 = vld [vmem:[%s2603_s13 + $0x4c] ss:$16 sps:$4 sm:$0xff]   ;;  %v2076_v21 = vld [vmem:[%s2603_s13 + $0x40] ss:$16 sps:$4 sm:$0xff]  }
  0x7a   : > { %796 = vmatprep.subr.bf16.mxu0 %v2066_v15  ;;  %869 = vmatprep.subr.bf16.mxu1 %v2068_v16  ;;  %v2077_v22 = vld [vmem:[%s2603_s13 + $0x48] ss:$16 sps:$4 sm:$0xff]   ;;  %v2078_v23 = vld [vmem:[%s2603_s13 + $0x64] ss:$16 sps:$4 sm:$0xff]   ;;  %v2080_v24 = vld [vmem:[%s2603_s13 + $0x6c] ss:$16 sps:$4 sm:$0xff]  }
  0x7b   : > { %v2082_v25 = vld [vmem:[%s2603_s13 + $0x60] ss:$16 sps:$4 sm:$0xff]   ;;  %v2083_v26 = vld [vmem:[%s2603_s13 + $0x68] ss:$16 sps:$4 sm:$0xff]   ;;  %v2084_v27 = vld [vmem:[%s2603_s13 + $0x84] ss:$16 sps:$4 sm:$0xff]  }
  0x7c   : > { %v2086_v28 = vld [vmem:[%s2603_s13 + $0x8c] ss:$16 sps:$4 sm:$0xff]   ;;  %v2088_v29 = vld [vmem:[%s2603_s13 + $0x80] ss:$16 sps:$4 sm:$0xff]   ;;  %v2089_v30 = vld [vmem:[%s2603_s13 + $0x88] ss:$16 sps:$4 sm:$0xff]  }
  0x7d   : > { %797 = vmatpush1.bf16.msra.mxu0 %v2070_v17  ;;  %870 = vmatpush1.bf16.msra.mxu1 %v2071_v18  ;;  %v2090_v31 = vld [vmem:[%s2603_s13 + $0xa4] ss:$16 sps:$4 sm:$0xff]   ;;  %v2092_v32 = vld [vmem:[%s2603_s13 + $0xac] ss:$16 sps:$4 sm:$0xff]   ;;  %v2094_v33 = vld [vmem:[%s2603_s13 + $0xa0] ss:$16 sps:$4 sm:$0xff]  }
  0x7e   : > { %798 = vmatprep.subr.bf16.mxu0 %v2072_v19  ;;  %871 = vmatprep.subr.bf16.mxu1 %v2074_v20  ;;  %v2095_v34 = vld [vmem:[%s2603_s13 + $0xa8] ss:$16 sps:$4 sm:$0xff]   ;;  %v2096_v35 = vld [vmem:[%s2603_s13 + $0xc4] ss:$16 sps:$4 sm:$0xff]   ;;  %v2098_v36 = vld [vmem:[%s2603_s13 + $0xcc] ss:$16 sps:$4 sm:$0xff]  }
  0x7f   : > { %v2100_v37 = vld [vmem:[%s2603_s13 + $0xc0] ss:$16 sps:$4 sm:$0xff]   ;;  %v2101_v38 = vld [vmem:[%s2603_s13 + $0xc8] ss:$16 sps:$4 sm:$0xff]   ;;  %v2102_v39 = vld [vmem:[%s2603_s13 + $0xe4] ss:$16 sps:$4 sm:$0xff]  }
  0x80   : > { %v2104_v40 = vld [vmem:[%s2603_s13 + $0xec] ss:$16 sps:$4 sm:$0xff]   ;;  %v2106_v41 = vld [vmem:[%s2603_s13 + $0xe0] ss:$16 sps:$4 sm:$0xff]   ;;  %v2107_v42 = vld [vmem:[%s2603_s13 + $0xe8] ss:$16 sps:$4 sm:$0xff]  }
  0x81   : > { %799 = vmatpush1.bf16.msra.mxu0 %v2076_v21  ;;  %872 = vmatpush1.bf16.msra.mxu1 %v2077_v22  ;;  %v2108_v43 = vld [vmem:[%s2601_s3] sm:$0xff]   ;;  %v2109_v44 = vld [vmem:[%s2601_s3 + $0x8] sm:$0xff]   ;;  %v2110_v45 = vld [vmem:[%s2601_s3 + $0x10] sm:$0xff]   ;;  %s1016_s26 = sld [smem:[#allocation3]] (!%p1920_p10)  ;;  %vm1026_vm1 = vcmask (!%p1920_p10), 31744   ;;  %s1923_s1 = sshll.u32 (!%p1920_p10), %s2380_s0, 6 }
  0x82   : > { %800 = vmatprep.subr.bf16.mxu0 %v2078_v23  ;;  %873 = vmatprep.subr.bf16.mxu1 %v2080_v24  ;;  %v2111_v46 = vld [vmem:[%s2601_s3 + $0x18] sm:$0xff]   ;;  %v538_v47 = vld [vmem:[#allocation2] sm:$0xff]  ;;  %v540_v48 = vld [vmem:[#allocation2 + $0x10] sm:$0xff]  ;;  %s1417_s3 = sld [smem:[#allocation4]] (!%p1920_p10)  ;;  %vm2404_vm10 = vmmov (!%p1920_p10), 1  }
  0x83   : > { %v539_v49 = vld [vmem:[#allocation2 + $0x8] sm:$0xff]  ;;  %v541_v50 = vld [vmem:[#allocation2 + $0x18] sm:$0xff]  ;;  %v542_v53 = vld [vmem:[#allocation2 + $0x20] sm:$0xff] }
  0x84   : > { %v544_v54 = vld [vmem:[#allocation2 + $0x30] sm:$0xff]  ;;  %v543_v59 = vld [vmem:[#allocation2 + $0x28] sm:$0xff]  ;;  %v545_v60 = vld [vmem:[#allocation2 + $0x38] sm:$0xff] }
  0x85   : > { %801 = vmatpush1.bf16.msra.mxu0 %v2082_v25  ;;  %874 = vmatpush1.bf16.msra.mxu1 %v2083_v26  ;;  %v546_v7 = vld [vmem:[#allocation2 + $0x40] sm:$0xff]  ;;  %v548_v8 = vld [vmem:[#allocation2 + $0x50] sm:$0xff]  ;;  %v547_v9 = vld [vmem:[#allocation2 + $0x48] sm:$0xff] }
  0x86   : > { %802 = vmatprep.subr.bf16.mxu0 %v2084_v27  ;;  %875 = vmatprep.subr.bf16.mxu1 %v2086_v28  ;;  %v549_v10 = vld [vmem:[#allocation2 + $0x58] sm:$0xff]  ;;  %v550_v13 = vld [vmem:[#allocation2 + $0x60] sm:$0xff]  ;;  %v552_v14 = vld [vmem:[#allocation2 + $0x70] sm:$0xff] }
  0x87   : > { %v551_v19 = vld [vmem:[#allocation2 + $0x68] sm:$0xff]  ;;  %v553_v20 = vld [vmem:[#allocation2 + $0x78] sm:$0xff] }
  0x89   : > { %803 = vmatpush1.bf16.msra.mxu0 %v2088_v29  ;;  %876 = vmatpush1.bf16.msra.mxu1 %v2089_v30 }
  0x8a   : > { %804 = vmatprep.subr.bf16.mxu0 %v2090_v31  ;;  %877 = vmatprep.subr.bf16.mxu1 %v2092_v32  ;;  %v554_v31 = vld [vmem:[#allocation2 + $0x80] sm:$0xff]  ;;  %v556_v32 = vld [vmem:[#allocation2 + $0x90] sm:$0xff] }
  0x8d   : > { %805 = vmatpush1.bf16.msra.mxu0 %v2094_v33  ;;  %878 = vmatpush1.bf16.msra.mxu1 %v2095_v34  ;;  %v555_v33 = vld [vmem:[#allocation2 + $0x88] sm:$0xff]  ;;  %v557_v34 = vld [vmem:[#allocation2 + $0x98] sm:$0xff] }
  0x8e   : > { %806 = vmatprep.subr.bf16.mxu0 %v2096_v35  ;;  %879 = vmatprep.subr.bf16.mxu1 %v2098_v36 }
  0x91   : > { %807 = vmatpush1.bf16.msra.mxu0 %v2100_v37  ;;  %880 = vmatpush1.bf16.msra.mxu1 %v2101_v38  ;;  %v558_v37 = vld [vmem:[#allocation2 + $0xa0] sm:$0xff]  ;;  %v560_v38 = vld [vmem:[#allocation2 + $0xb0] sm:$0xff] }
  0x92   : > { %808 = vmatprep.subr.bf16.mxu0 %v2102_v39  ;;  %881 = vmatprep.subr.bf16.mxu1 %v2104_v40 }
  0x95   : > { %809 = vmatpush1.bf16.msra.mxu0 %v2106_v41  ;;  %882 = vmatpush1.bf16.msra.mxu1 %v2107_v42 }
  0x98   : > { %827 = vmatmul.mubr.bf16.vlgmr.msra.gmra.mrb[0].mxu0 %v2108_v43  ;;  %900 = vmatmul.mubr.bf16.vlgmr.msra.gmra.mrb[0].mxu1 %v2108_v43  ;;  %v559_v43 = vld [vmem:[#allocation2 + $0xa8] sm:$0xff] }
  0x99   : > { %836 = vmatprep.mubr.bf16.mxu0 %v2399_v12  ;;  %909 = vmatprep.mubr.bf16.mxu1 %v2399_v12 }
  0xa0   : > { %837 = vmatmul.mubr.bf16.gmra.mrb[4].mxu0 %v2109_v44  ;;  %910 = vmatmul.mubr.bf16.gmra.mrb[4].mxu1 %v2109_v44  ;;  %v561_v44 = vld [vmem:[#allocation2 + $0xb8] sm:$0xff] }
  0xa1   : > { %846 = vmatprep.mubr.bf16.mxu0 %v2399_v12  ;;  %919 = vmatprep.mubr.bf16.mxu1 %v2399_v12 }
  0xa8   : > { %847 = vmatmul.mubr.bf16.gmra.mrb[8].mxu0 %v2110_v45  ;;  %920 = vmatmul.mubr.bf16.gmra.mrb[8].mxu1 %v2110_v45 }
  0xa9   : > { %856 = vmatprep.mubr.bf16.mxu0 %v2399_v12  ;;  %929 = vmatprep.mubr.bf16.mxu1 %v2399_v12 }
  0xb0   : > { %857 = vmatmul.mubr.bf16.gmra.mrb[12].mxu0 %v2111_v46  ;;  %930 = vmatmul.mubr.bf16.gmra.mrb[12].mxu1 %v2111_v46 }
 0x16b   : > { %v828_v51 = vpop.f32.mrb[0].mxu0  ;;  %v901_v52 = vpop.f32.mrb[0].mxu1 }
 0x16c   : > { %v940_v55 = vadd.f32 %v828_v51, %v538_v47  ;;  %v942_v56 = vadd.f32 %v901_v52, %v540_v48  ;;  %v830_v57 = vpop.f32.mrb[1].mxu0  ;;  %v903_v58 = vpop.f32.mrb[1].mxu1 }
 0x16d   : > { %v941_v61 = vadd.f32 %v830_v57, %v539_v49  ;;  %v943_v62 = vadd.f32 %v903_v58, %v541_v50  ;;  %v832_v63 = vpop.f32.mrb[2].mxu0  ;;  %v905_v0 = vpop.f32.mrb[2].mxu1  ;;  %v563_v57 = vld [vmem:[#allocation2 + $0xc8] sm:$0xff]  ;;  %v565_v58 = vld [vmem:[#allocation2 + $0xd8] sm:$0xff] }
 0x16e   : > { %972 = vst [vmem:[#allocation2] sm:$0xff] %v940_v55  ;;  %974 = vst [vmem:[#allocation2 + $0x10] sm:$0xff] %v942_v56  ;;  %v944_v1 = vadd.f32 %v832_v63, %v542_v53  ;;  %v946_v2 = vadd.f32 %v905_v0, %v544_v54  ;;  %v834_v3 = vpop.f32.mrb[3].mxu0  ;;  %v907_v4 = vpop.f32.mrb[3].mxu1  ;;  %v562_v55 = vld [vmem:[#allocation2 + $0xc0] sm:$0xff]  ;;  %v564_v56 = vld [vmem:[#allocation2 + $0xd0] sm:$0xff] }
 0x16f   : > { %973 = vst [vmem:[#allocation2 + $0x8] sm:$0xff] %v941_v61  ;;  %975 = vst [vmem:[#allocation2 + $0x18] sm:$0xff] %v943_v62  ;;  %v945_v5 = vadd.f32 %v834_v3, %v543_v59  ;;  %v947_v6 = vadd.f32 %v907_v4, %v545_v60  ;;  %v566_v61 = vld [vmem:[#allocation2 + $0xe0] sm:$0xff]  ;;  %v568_v62 = vld [vmem:[#allocation2 + $0xf0] sm:$0xff] }
 0x170   : > { %976 = vst [vmem:[#allocation2 + $0x20] sm:$0xff] %v944_v1  ;;  %978 = vst [vmem:[#allocation2 + $0x30] sm:$0xff] %v946_v2  ;;  %v567_v3 = vld [vmem:[#allocation2 + $0xe8] sm:$0xff]  ;;  %v569_v4 = vld [vmem:[#allocation2 + $0xf8] sm:$0xff] }
 0x171   : > { %977 = vst [vmem:[#allocation2 + $0x28] sm:$0xff] %v945_v5  ;;  %979 = vst [vmem:[#allocation2 + $0x38] sm:$0xff] %v947_v6 }
 0x173   : > { %v838_v11 = vpop.f32.mrb[4].mxu0  ;;  %v911_v12 = vpop.f32.mrb[4].mxu1 }
 0x174   : > { %v948_v15 = vadd.f32 %v838_v11, %v546_v7  ;;  %v950_v16 = vadd.f32 %v911_v12, %v548_v8  ;;  %v840_v17 = vpop.f32.mrb[5].mxu0  ;;  %v913_v18 = vpop.f32.mrb[5].mxu1 }
 0x175   : > { %v949_v21 = vadd.f32 %v840_v17, %v547_v9  ;;  %v951_v22 = vadd.f32 %v913_v18, %v549_v10  ;;  %v842_v23 = vpop.f32.mrb[6].mxu0  ;;  %v915_v24 = vpop.f32.mrb[6].mxu1  ;;  %v2675_v17 = vld [vmem:[%s2615_s22 + $0x8] sm:$0xff] (!%p1920_p10)  ;;  %v2678_v18 = vld [vmem:[%s2615_s22 + $0x18] sm:$0xff] (!%p1920_p10) }
 0x176   : > { %980 = vst [vmem:[#allocation2 + $0x40] sm:$0xff] %v948_v15  ;;  %982 = vst [vmem:[#allocation2 + $0x50] sm:$0xff] %v950_v16  ;;  %v952_v25 = vadd.f32 %v842_v23, %v550_v13  ;;  %v954_v26 = vadd.f32 %v915_v24, %v552_v14  ;;  %v844_v27 = vpop.f32.mrb[7].mxu0  ;;  %v917_v28 = vpop.f32.mrb[7].mxu1  ;;  %v2669_v15 = vld [vmem:[%s2615_s22] sm:$0xff] (!%p1920_p10)  ;;  %v2672_v16 = vld [vmem:[%s2615_s22 + $0x10] sm:$0xff] (!%p1920_p10) }
 0x177   : > { %981 = vst [vmem:[#allocation2 + $0x48] sm:$0xff] %v949_v21  ;;  %983 = vst [vmem:[#allocation2 + $0x58] sm:$0xff] %v951_v22  ;;  %v953_v29 = vadd.f32 %v844_v27, %v551_v19  ;;  %v955_v30 = vadd.f32 %v917_v28, %v553_v20  ;;  %v1017_v19 = vstv (!%p1920_p10), %s1016_s26  ;;  %v2685_v24 = vld [vmem:[%s2615_s22 + $0x20] sm:$0xff] (!%p1920_p10) }
 0x178   : > { %984 = vst [vmem:[#allocation2 + $0x60] sm:$0xff] %v952_v25  ;;  %986 = vst [vmem:[#allocation2 + $0x70] sm:$0xff] %v954_v26  ;;  %v1018_v20 = vsub.f32 (!%p1920_p10), %v2669_v15, %v1017_v19  ;;  %v1020_v21 = vsub.f32 (!%p1920_p10), %v2672_v16, %v1017_v19  ;;  %v1019_v22 = vsub.f32 (!%p1920_p10), %v2675_v17, %v1017_v19  ;;  %v2688_v25 = vld [vmem:[%s2615_s22 + $0x28] sm:$0xff] (!%p1920_p10) }
 0x179   : > { %985 = vst [vmem:[#allocation2 + $0x68] sm:$0xff] %v953_v29  ;;  %987 = vst [vmem:[#allocation2 + $0x78] sm:$0xff] %v955_v30  ;;  %v1021_v23 = vsub.f32 (!%p1920_p10), %v2678_v18, %v1017_v19  ;;  %v1022_v30 = vsub.f32 (!%p1920_p10), %v2685_v24, %v1017_v19 }
 0x17a   : > { %v1027_v26 = vsel (!%p1920_p10), %vm1026_vm1, %v1018_v20, -inf  ;;  %v1033_v27 = vsel (!%p1920_p10), %vm1026_vm1, %v1020_v21, -inf  ;;  %v1030_v28 = vsel (!%p1920_p10), %vm1026_vm1, %v1019_v22, -inf }
 0x17b   : > { %v848_v35 = vpop.f32.mrb[8].mxu0  ;;  %v921_v36 = vpop.f32.mrb[8].mxu1  ;;  %1028 = vmax.xlane.f32.xlu0 (!%p1920_p10), %v1027_v26  ;;  %1034 = vmax.xlane.f32.xlu1 (!%p1920_p10), %v1033_v27  ;;  %v1036_v29 = vsel (!%p1920_p10), %vm1026_vm1, %v1021_v23, -inf }
 0x17c   : > { %v956_v39 = vadd.f32 %v848_v35, %v554_v31  ;;  %v958_v40 = vadd.f32 %v921_v36, %v556_v32  ;;  %v850_v41 = vpop.f32.mrb[9].mxu0  ;;  %v923_v42 = vpop.f32.mrb[9].mxu1  ;;  %v1023_v31 = vsub.f32 (!%p1920_p10), %v2688_v25, %v1017_v19  ;;  %v2697_v32 = vld [vmem:[%s2615_s22 + $0x30] sm:$0xff] (!%p1920_p10) }
 0x17d   : > { %v957_v45 = vadd.f32 %v850_v41, %v555_v33  ;;  %v959_v46 = vadd.f32 %v923_v42, %v557_v34  ;;  %v852_v47 = vpop.f32.mrb[10].mxu0  ;;  %v925_v48 = vpop.f32.mrb[10].mxu1  ;;  %v2700_v33 = vld [vmem:[%s2615_s22 + $0x38] sm:$0xff] (!%p1920_p10)  ;;  %v1039_v34 = vsel (!%p1920_p10), %vm1026_vm1, %v1022_v30, -inf  ;;  %v1024_v36 = vsub.f32 (!%p1920_p10), %v2697_v32, %v1017_v19 }
 0x17e   : > { %988 = vst [vmem:[#allocation2 + $0x80] sm:$0xff] %v956_v39  ;;  %990 = vst [vmem:[#allocation2 + $0x90] sm:$0xff] %v958_v40  ;;  %v960_v49 = vadd.f32 %v852_v47, %v558_v37  ;;  %v962_v50 = vadd.f32 %v925_v48, %v560_v38  ;;  %v854_v51 = vpop.f32.mrb[11].mxu0  ;;  %v927_v52 = vpop.f32.mrb[11].mxu1  ;;  %v1042_v35 = vsel (!%p1920_p10), %vm1026_vm1, %v1023_v31, -inf  ;;  %v1025_v37 = vsub.f32 (!%p1920_p10), %v2700_v33, %v1017_v19 }
 0x17f   : > { %989 = vst [vmem:[#allocation2 + $0x88] sm:$0xff] %v957_v45  ;;  %991 = vst [vmem:[#allocation2 + $0x98] sm:$0xff] %v959_v46  ;;  %v961_v53 = vadd.f32 %v854_v51, %v559_v43  ;;  %v963_v54 = vadd.f32 %v927_v52, %v561_v44  ;;  %1031 = vmax.xlane.f32.xlu0 (!%p1920_p10), %v1030_v28  ;;  %1037 = vmax.xlane.f32.xlu1 (!%p1920_p10), %v1036_v29  ;;  %v1045_v38 = vsel (!%p1920_p10), %vm1026_vm1, %v1024_v36, -inf }
 0x180   : > { %992 = vst [vmem:[#allocation2 + $0xa0] sm:$0xff] %v960_v49  ;;  %994 = vst [vmem:[#allocation2 + $0xb0] sm:$0xff] %v962_v50  ;;  %v1048_v39 = vsel (!%p1920_p10), %vm1026_vm1, %v1025_v37, -inf  ;;  %v1051_v52 = vmul.f32 (!%p1920_p10), 12.0, %v1018_v20 }
 0x181   : > { %993 = vst [vmem:[#allocation2 + $0xa8] sm:$0xff] %v961_v53  ;;  %995 = vst [vmem:[#allocation2 + $0xb8] sm:$0xff] %v963_v54  ;;  %v1053_v53 = vmul.f32 (!%p1920_p10), 12.0, %v1020_v21 }
 0x183   : > { %v858_v59 = vpop.f32.mrb[12].mxu0  ;;  %v931_v60 = vpop.f32.mrb[12].mxu1  ;;  %1007 = sbr.rel (%p1920_p10) target bundleno = 1351 (0x547), region = 109  ;;  %1040 = vmax.xlane.f32.xlu0 (!%p1920_p10), %v1039_v34  ;;  %1043 = vmax.xlane.f32.xlu1 (!%p1920_p10), %v1042_v35 }
 0x184   : > { %v964_v63 = vadd.f32 %v858_v59, %v562_v55  ;;  %v966_v0 = vadd.f32 %v931_v60, %v564_v56  ;;  %v860_v1 = vpop.f32.mrb[13].mxu0  ;;  %v933_v2 = vpop.f32.mrb[13].mxu1  ;;  %v1052_v60 = vmul.f32 (!%p1920_p10), 12.0, %v1019_v22 }
 0x185   : > { %v965_v5 = vadd.f32 %v860_v1, %v563_v57  ;;  %v967_v6 = vadd.f32 %v933_v2, %v565_v58  ;;  %v862_v7 = vpop.f32.mrb[14].mxu0  ;;  %v935_v8 = vpop.f32.mrb[14].mxu1 }
 0x186   : > { %996 = vst [vmem:[#allocation2 + $0xc0] sm:$0xff] %v964_v63  ;;  %998 = vst [vmem:[#allocation2 + $0xd0] sm:$0xff] %v966_v0  ;;  %v968_v9 = vadd.f32 %v862_v7, %v566_v61  ;;  %v970_v10 = vadd.f32 %v935_v8, %v568_v62  ;;  %v864_v11 = vpop.f32.mrb[15].mxu0  ;;  %v937_v12 = vpop.f32.mrb[15].mxu1  ;;  %v1054_v62 = vmul.f32 (!%p1920_p10), 12.0, %v1021_v23 }
 0x187   : > { %997 = vst [vmem:[#allocation2 + $0xc8] sm:$0xff] %v965_v5  ;;  %999 = vst [vmem:[#allocation2 + $0xd8] sm:$0xff] %v967_v6  ;;  %v969_v13 = vadd.f32 %v864_v11, %v567_v3  ;;  %v971_v14 = vadd.f32 %v937_v12, %v569_v4  ;;  %1046 = vmax.xlane.f32.xlu0 (!%p1920_p10), %v1045_v38  ;;  %1049 = vmax.xlane.f32.xlu1 (!%p1920_p10), %v1048_v39  ;;  %v1055_v4 = vmul.f32 (!%p1920_p10), 12.0, %v1022_v30 }
 0x188   : > { %1000 = vst [vmem:[#allocation2 + $0xe0] sm:$0xff] %v968_v9  ;;  %1002 = vst [vmem:[#allocation2 + $0xf0] sm:$0xff] %v970_v10  ;;  %v1056_v6 = vmul.f32 (!%p1920_p10), 12.0, %v1023_v31  ;;  %v1057_v12 = vmul.f32 (!%p1920_p10), 12.0, %v1024_v36 }
 0x189   : > { %1001 = vst [vmem:[#allocation2 + $0xe8] sm:$0xff] %v969_v13  ;;  %1003 = vst [vmem:[#allocation2 + $0xf8] sm:$0xff] %v971_v14  ;;  %v1058_v14 = vmul.f32 (!%p1920_p10), 12.0, %v1025_v37 }
 0x208   : > { %v1029_v40 = vpop.xlane.xlu0 %1028  ;;  %v1035_v41 = vpop.xlane.xlu1 %1034 }
 0x209   : > { %v1059_v42 = vmax.f32 %v1029_v40, 1e-30  ;;  %v1061_v43 = vmax.f32 %v1035_v41, 1e-30 }
 0x20b   : > { %2142 = vrcp.f32 %v1059_v42 }
 0x20c   : > { %2144 = vrcp.f32 %v1061_v43  ;;  %v1032_v44 = vpop.xlane.xlu0 %1031  ;;  %v1038_v45 = vpop.xlane.xlu1 %1037 }
 0x20d   : > { %v1060_v46 = vmax.f32 %v1032_v44, 1e-30  ;;  %v1062_v47 = vmax.f32 %v1038_v45, 1e-30 }
 0x20f   : > { %2146 = vrcp.f32 %v1060_v46 }
 0x210   : > { %2148 = vrcp.f32 %v1062_v47  ;;  %v1041_v48 = vpop.xlane.xlu0 %1040  ;;  %v1044_v49 = vpop.xlane.xlu1 %1043 }
 0x211   : > { %v1063_v50 = vmax.f32 %v1041_v48, 1e-30  ;;  %v1064_v51 = vmax.f32 %v1044_v49, 1e-30  ;;  %v2400_v48 = vmov 0  }
 0x212   : > { %2112 = vset.pattern.permute.xlu0 %v2400_v48  ;;  %2113 = vset.pattern.permute.xlu1 %v2400_v48 }
 0x213   : > { %2150 = vrcp.f32 %v1063_v50 }
 0x214   : > { %2152 = vrcp.f32 %v1064_v51  ;;  %v1047_v54 = vpop.xlane.xlu0 %1046  ;;  %v1050_v55 = vpop.xlane.xlu1 %1049 }
 0x215   : > { %v2143_v56 = vpop.eup %2142  ;;  %v1065_v57 = vmax.f32 %v1047_v54, 1e-30  ;;  %v1066_v58 = vmax.f32 %v1050_v55, 1e-30 }
 0x216   : > { %v2145_v59 = vpop.eup %2144  ;;  %v1068_v61 = vmul.f32 %v2143_v56, %v1051_v52 }
 0x217   : > { %v1072_v63 = vmul.f32 %v2145_v59, %v1053_v53  ;;  %2154 = vrcp.f32 %v1065_v57 }
 0x218   : > { %2156 = vrcp.f32 %v1066_v58  ;;  %v1083_v0 = vmul.f32 1.442695, %v1068_v61  ;;  %v2401_v58 = vmov 1  }
 0x219   : > { %v2147_v1 = vpop.eup %2146  ;;  %v1087_v2 = vmul.f32 1.442695, %v1072_v63  ;;  %v2402_v63 = vmov 3  }
 0x21a   : > { %v2149_v3 = vpop.eup %2148  ;;  %v1070_v5 = vmul.f32 %v2147_v1, %v1052_v60  ;;  %2158 = vpow2.f32 %v1083_v0 }
 0x21b   : > { %v1074_v7 = vmul.f32 %v2149_v3, %v1054_v62  ;;  %2160 = vpow2.f32 %v1087_v2  ;;  %v2403_v2 = vmov 2  }
 0x21c   : > { %v1085_v8 = vmul.f32 1.442695, %v1070_v5 }
 0x21d   : > { %v2151_v9 = vpop.eup %2150  ;;  %v1089_v10 = vmul.f32 1.442695, %v1074_v7 }
 0x21e   : > { %v2153_v11 = vpop.eup %2152  ;;  %v1076_v13 = vmul.f32 %v2151_v9, %v1055_v4  ;;  %2162 = vpow2.f32 %v1085_v8 }
 0x21f   : > { %v1078_v19 = vmul.f32 %v2153_v11, %v1056_v6  ;;  %2164 = vpow2.f32 %v1089_v10 }
 0x220   : > { %v1091_v20 = vmul.f32 1.442695, %v1076_v13 }
 0x221   : > { %v2155_v21 = vpop.eup %2154  ;;  %v1093_v22 = vmul.f32 1.442695, %v1078_v19 }
 0x222   : > { %v2157_v23 = vpop.eup %2156  ;;  %v1080_v26 = vmul.f32 %v2155_v21, %v1057_v12  ;;  %2166 = vpow2.f32 %v1091_v20 }
 0x223   : > { %v1082_v27 = vmul.f32 %v2157_v23, %v1058_v14  ;;  %2168 = vpow2.f32 %v1093_v22  ;;  %v1144_v23 = vld [vmem:[#allocation2 + $0x28] sm:$0xff] }
 0x224   : > { %v2159_v28 = vpop.eup %2158  ;;  %v1095_v29 = vmul.f32 1.442695, %v1080_v26  ;;  %v1143_v26 = vld [vmem:[#allocation2 + $0x20] sm:$0xff] }
 0x225   : > { %v2161_v30 = vpop.eup %2160  ;;  %v1099_v31 = vsel %vm1026_vm1, %v2159_v28, 0.0  ;;  %v1097_v34 = vmul.f32 1.442695, %v1082_v27 }
 0x226   : > { %1100 = vadd.xlane.f32.xlu0 %v1099_v31  ;;  %2170 = vpow2.f32 %v1095_v29  ;;  %v1105_v35 = vsel %vm1026_vm1, %v2161_v30, 0.0  ;;  %v1145_v29 = vld [vmem:[#allocation2 + $0x30] sm:$0xff]  ;;  %v1146_v31 = vld [vmem:[#allocation2 + $0x38] sm:$0xff] }
 0x227   : > { %2172 = vpow2.f32 %v1097_v34 }
 0x228   : > { %v2163_v36 = vpop.eup %2162 }
 0x229   : > { %v2165_v37 = vpop.eup %2164  ;;  %v1102_v38 = vsel %vm1026_vm1, %v2163_v36, 0.0 }
 0x22a   : > { %1106 = vadd.xlane.f32.xlu0 %v1105_v35  ;;  %1103 = vadd.xlane.f32.xlu1 %v1102_v38  ;;  %v1108_v39 = vsel %vm1026_vm1, %v2165_v37, 0.0 }
 0x22c   : > { %v2712_v40 = vpop.eup %2166 }
 0x22d   : > { %v2169_v41 = vpop.eup %2168  ;;  %v1111_v42 = vsel %vm1026_vm1, %v2712_v40, 0.0 }
 0x22e   : > { %1109 = vadd.xlane.f32.xlu1 %v1108_v39  ;;  %1112 = vadd.xlane.f32.xlu0 %v1111_v42  ;;  %v1114_v43 = vsel %vm1026_vm1, %v2169_v41, 0.0 }
 0x230   : > { %v2171_v44 = vpop.eup %2170 }
 0x231   : > { %v2717_v45 = vpop.eup %2172  ;;  %v1117_v46 = vsel %vm1026_vm1, %v2171_v44, 0.0 }
 0x232   : > { %1115 = vadd.xlane.f32.xlu1 %v1114_v43  ;;  %1118 = vadd.xlane.f32.xlu0 %v1117_v46  ;;  %v1120_v47 = vsel %vm1026_vm1, %v2717_v45, 0.0  ;;  %v1140_v43 = vld [vmem:[#allocation2 + $0x8] sm:$0xff]  ;;  %v1139_v46 = vld [vmem:[#allocation2] sm:$0xff] }
 0x236   : > { %1121 = vadd.xlane.f32.xlu1 %v1120_v47  ;;  %v1141_v47 = vld [vmem:[#allocation2 + $0x10] sm:$0xff] }
 0x2b3   : > { %v1101_v49 = vpop.xlane.xlu0 %1100 }
 0x2b4   : > { %2174 = vrcp.f32 %v1101_v49 }
 0x2b7   : > { %v1104_v50 = vpop.xlane.xlu1 %1103  ;;  %v1107_v53 = vpop.xlane.xlu0 %1106 }
 0x2b8   : > { %2176 = vrcp.f32 %v1104_v50 }
 0x2bb   : > { %v1110_v51 = vpop.xlane.xlu1 %1109  ;;  %v1113_v57 = vpop.xlane.xlu0 %1112 }
 0x2bc   : > { %2178 = vrcp.f32 %v1110_v51 }
 0x2bd   : > { %2180 = vrcp.f32 %v1107_v53 }
 0x2be   : > { %v2175_v52 = vpop.eup %2174 }
 0x2bf   : > { %v1124_v54 = vmul.f32 %v2175_v52, %v2159_v28  ;;  %v1116_v60 = vpop.xlane.xlu1 %1115  ;;  %v1119_v62 = vpop.xlane.xlu0 %1118 }
 0x2c0   : > { %2182 = vrcp.f32 %v1116_v60 }
 0x2c1   : > { %1173 = vperm.xlu0 %2112, %v1124_v54   ;;  %2184 = vrcp.f32 %v1119_v62 }
 0x2c2   : > { %v2177_v55 = vpop.eup %2176  ;;  %2186 = vrcp.f32 %v1113_v57 }
 0x2c3   : > { %v1126_v56 = vmul.f32 %v2177_v55, %v2163_v36  ;;  %v1122_v9 = vpop.xlane.xlu1 %1121 }
 0x2c4   : > { %2188 = vrcp.f32 %v1122_v9  ;;  %v1150_v9 = vld [vmem:[#allocation2 + $0x58] sm:$0xff] }
 0x2c5   : > { %1178 = vperm.xlu1 %2113, %v1126_v56   ;;  %2119 = vset.pattern.permute.xlu0 %v2401_v58 }
 0x2c6   : > { %v2179_v59 = vpop.eup %2178 }
 0x2c7   : > { %v1130_v61 = vmul.f32 %v2179_v59, %v2165_v37  ;;  %v2181_v0 = vpop.eup %2180 }
 0x2c8   : > { %v1128_v1 = vmul.f32 %v2181_v0, %v2161_v30 }
 0x2c9   : > { %2114 = vset.pattern.permute.xlu1 %v2401_v58  ;;  %1232 = vperm.xlu0 %2119, %v1130_v61  }
 0x2ca   : > { %1220 = vperm.xlu1 %2114, %v1124_v54   ;;  %v2183_v3 = vpop.eup %2182 }
 0x2cb   : > { %v1134_v4 = vmul.f32 %v2183_v3, %v2169_v41  ;;  %v2185_v5 = vpop.eup %2184 }
 0x2cc   : > { %v1136_v6 = vmul.f32 %v2185_v5, %v2171_v44  ;;  %v2187_v7 = vpop.eup %2186 }
 0x2cd   : > { %2122 = vset.pattern.permute.xlu0 %v2402_v63  ;;  %v1132_v8 = vmul.f32 %v2187_v7, %v2712_v40  ;;  %v2752_v40 = vld [vmem:[%s3179_s6] ss:$0 sm:$0xff] }
 0x2ce   : > { %1224 = vperm.xlu1 %2114, %v1126_v56   ;;  %1320 = vperm.xlu0 %2122, %v1126_v56   ;;  %v2189_v10 = vpop.eup %2188 }
 0x2cf   : > { %v1138_v11 = vmul.f32 %v2189_v10, %v2717_v45  ;;  %v2758_v45 = vld [vmem:[%s3180_s7] ss:$0 sm:$0xff] }
 0x2d2   : > { %2115 = vset.pattern.permute.xlu1 %v2400_v48  ;;  %2125 = vset.pattern.permute.xlu0 %v2403_v2 }
 0x2d3   : > { %1280 = vperm.xlu0 %2125, %v1130_v61   ;;  %1183 = vperm.xlu1 %2115, %v1128_v1  }
 0x2d7   : > { %2128 = vset.pattern.permute.xlu0 %v2401_v58  ;;  %2116 = vset.pattern.permute.xlu1 %v2401_v58 }
 0x2d8   : > { %1240 = vperm.xlu0 %2128, %v1134_v4   ;;  %1228 = vperm.xlu1 %2116, %v1128_v1  }
 0x2dc   : > { %2131 = vset.pattern.permute.xlu0 %v2400_v48  ;;  %2117 = vset.pattern.permute.xlu1 %v2403_v2 }
 0x2dd   : > { %1268 = vperm.xlu1 %2117, %v1124_v54   ;;  %1203 = vperm.xlu0 %2131, %v1136_v6  }
 0x2e1   : > { %1272 = vperm.xlu1 %2117, %v1126_v56   ;;  %2134 = vset.pattern.permute.xlu0 %v2402_v63 }
 0x2e2   : > { %1332 = vperm.xlu0 %2134, %v1132_v8  }
 0x2e5   : > { %2118 = vset.pattern.permute.xlu1 %v2400_v48 }
 0x2e6   : > { %1188 = vperm.xlu1 %2118, %v1130_v61   ;;  %2137 = vset.pattern.permute.xlu0 %v2403_v2 }
 0x2e7   : > { %1292 = vperm.xlu0 %2137, %v1136_v6  }
 0x2ea   : > { %2120 = vset.pattern.permute.xlu1 %v2403_v2 }
 0x2eb   : > { %1276 = vperm.xlu1 %2120, %v1128_v1   ;;  %2140 = vset.pattern.permute.xlu0 %v2402_v63 }
 0x2ec   : > { %1340 = vperm.xlu0 %2140, %v1136_v6  }
 0x2ef   : > { %2121 = vset.pattern.permute.xlu1 %v2402_v63 }
 0x2f0   : > { %1316 = vperm.xlu1 %2121, %v1124_v54   ;;  %v1142_v54 = vld [vmem:[#allocation2 + $0x18] sm:$0xff] }
 0x2f4   : > { %2123 = vset.pattern.permute.xlu1 %v2400_v48 }
 0x2f5   : > { %1193 = vperm.xlu1 %2123, %v1132_v8  }
 0x2f9   : > { %2124 = vset.pattern.permute.xlu1 %v2401_v58 }
 0x2fa   : > { %1236 = vperm.xlu1 %2124, %v1132_v8  }
 0x2fe   : > { %2126 = vset.pattern.permute.xlu1 %v2402_v63 }
 0x2ff   : > { %1324 = vperm.xlu1 %2126, %v1128_v1   ;;  %v1147_v1 = vld [vmem:[#allocation2 + $0x40] sm:$0xff] }
 0x303   : > { %2127 = vset.pattern.permute.xlu1 %v2400_v48 }
 0x304   : > { %1198 = vperm.xlu1 %2127, %v1134_v4  }
 0x308   : > { %2129 = vset.pattern.permute.xlu1 %v2403_v2 }
 0x309   : > { %1284 = vperm.xlu1 %2129, %v1132_v8  }
 0x30d   : > { %2130 = vset.pattern.permute.xlu1 %v2402_v63 }
 0x30e   : > { %1328 = vperm.xlu1 %2130, %v1130_v61  }
 0x312   : > { %2132 = vset.pattern.permute.xlu1 %v2401_v58 }
 0x313   : > { %1244 = vperm.xlu1 %2132, %v1136_v6  }
 0x317   : > { %2133 = vset.pattern.permute.xlu1 %v2403_v2 }
 0x318   : > { %1288 = vperm.xlu1 %2133, %v1134_v4  }
 0x31c   : > { %2135 = vset.pattern.permute.xlu1 %v2400_v48 }
 0x31d   : > { %1208 = vperm.xlu1 %2135, %v1138_v11  }
 0x321   : > { %2136 = vset.pattern.permute.xlu1 %v2401_v58 }
 0x322   : > { %1248 = vperm.xlu1 %2136, %v1138_v11  }
 0x326   : > { %2138 = vset.pattern.permute.xlu1 %v2402_v63 }
 0x327   : > { %1336 = vperm.xlu1 %2138, %v1134_v4  }
 0x32b   : > { %2139 = vset.pattern.permute.xlu1 %v2403_v2  ;;  %v1149_v2 = vld [vmem:[#allocation2 + $0x50] sm:$0xff] }
 0x32c   : > { %1296 = vperm.xlu1 %2139, %v1138_v11  }
 0x330   : > { %2141 = vset.pattern.permute.xlu1 %v2402_v63  ;;  %v1148_v63 = vld [vmem:[#allocation2 + $0x48] sm:$0xff] }
 0x331   : > { %1344 = vperm.xlu1 %2141, %v1138_v11  }
 0x340   : > { %v1174_v20 = vpop.permute.xlu0 %1173 }
 0x341   : > { %v1211_v52 = vmul.f32 %v1174_v20, %v1139_v46 }
 0x344   : > { %v1179_v12 = vpop.permute.xlu1 %1178 }
 0x345   : > { %v1212_v30 = vmul.f32 %v1179_v12, %v1143_v26  ;;  %v1151_v26 = vld [vmem:[#allocation2 + $0x60] sm:$0xff] }
 0x348   : > { %v2747_v22 = vpop.permute.xlu0 %1232 }
 0x349   : > { %v1221_v13 = vpop.permute.xlu1 %1220 }
 0x34a   : > { %v1251_v49 = vmul.f32 %v1221_v13, %v1140_v43  ;;  %v1153_v43 = vld [vmem:[#allocation2 + $0x70] sm:$0xff] }
 0x34c   : > { %v1259_v55 = vadd.f32 %v1251_v49, %v1211_v52 }
 0x34d   : > { %v1225_v14 = vpop.permute.xlu1 %1224  ;;  %v1321_v34 = vpop.permute.xlu0 %1320 }
 0x34e   : > { %v1252_v28 = vmul.f32 %v1225_v14, %v1144_v23  ;;  %v1348_v38 = vmul.f32 %v1321_v34, %v1146_v31  ;;  %v1156_v23 = vld [vmem:[#allocation2 + $0x88] sm:$0xff]  ;;  %v1157_v34 = vld [vmem:[#allocation2 + $0x90] sm:$0xff] }
 0x350   : > { %v1260_v36 = vadd.f32 %v1252_v28, %v1212_v30 }
 0x352   : > { %v1184_v19 = vpop.permute.xlu1 %1183  ;;  %v1281_v62 = vpop.permute.xlu0 %1280 }
 0x353   : > { %v1213_v6 = vmul.f32 %v1184_v19, %v1147_v1 }
 0x357   : > { %v1229_v21 = vpop.permute.xlu1 %1228  ;;  %v2763_v8 = vpop.permute.xlu0 %1240 }
 0x358   : > { %v1253_v4 = vmul.f32 %v1229_v21, %v1148_v63  ;;  %v1152_v21 = vld [vmem:[#allocation2 + $0x68] sm:$0xff] }
 0x35a   : > { %v1261_v10 = vadd.f32 %v1253_v4, %v1213_v6 }
 0x35c   : > { %v1269_v27 = vpop.permute.xlu1 %1268  ;;  %v1204_v20 = vpop.permute.xlu0 %1203 }
 0x35d   : > { %v1299_v53 = vmul.f32 %v1269_v27, %v1141_v47 }
 0x35f   : > { %v1307_v57 = vadd.f32 %v1299_v53, %v1259_v55 }
 0x360   : > { %v1273_v35 = vpop.permute.xlu1 %1272 }
 0x361   : > { %v1300_v37 = vmul.f32 %v1273_v35, %v1145_v29  ;;  %v1155_v29 = vld [vmem:[#allocation2 + $0x80] sm:$0xff] }
 0x363   : > { %v1308_v39 = vadd.f32 %v1300_v37, %v1260_v36  ;;  %v1254_v37 = vmul.f32 %v2747_v22, %v1152_v21  ;;  %v1163_v22 = vld [vmem:[#allocation2 + $0xc0] sm:$0xff] }
 0x365   : > { %v1356_v41 = vadd.f32 %v1348_v38, %v1308_v39  ;;  %v1189_v42 = vpop.permute.xlu1 %1188  ;;  %v1158_v38 = vld [vmem:[#allocation2 + $0x98] sm:$0xff]  ;;  %v1333_v39 = vpop.permute.xlu0 %1332 }
 0x366   : > { %v1214_v19 = vmul.f32 %v1189_v42, %v1151_v26 }
 0x367   : > { %v1371_v44 = vadd.f32 %v2752_v40, %v1356_v41 }
 0x368   : > { %v1262_v47 = vadd.f32 %v1254_v37, %v1214_v19 }
 0x369   : > { %v1379_v48 = vmax.f32 %v1371_v44, 0.0  ;;  %v1293_v53 = vpop.permute.xlu0 %1292 }
 0x36a   : > { %v1277_v50 = vpop.permute.xlu1 %1276 }
 0x36b   : > { %v1394_v51 = vmul.f32 %v2758_v45, %v1379_v48  ;;  %v1301_v7 = vmul.f32 %v1277_v50, %v1149_v2  ;;  %v1351_v48 = vmul.f32 %v1333_v39, %v1158_v38  ;;  %v1154_v50 = vld [vmem:[#allocation2 + $0x78] sm:$0xff]  ;;  %v1476_v38 = vsel %vm1026_vm1, %v2672_v16, -inf }
 0x36c   : > { %v1488_v16 = vsel %vm1026_vm1, %v2697_v32, -inf  ;;  %v1479_v32 = vsel %vm1026_vm1, %v2678_v18, -inf }
 0x36d   : > { %1403 = vadd.xlane.f32.xlu0 %v1394_v51  ;;  %v1309_v12 = vadd.f32 %v1301_v7, %v1261_v10  ;;  %v1302_v51 = vmul.f32 %v1281_v62, %v1153_v43  ;;  %v1166_v62 = vld [vmem:[#allocation2 + $0xd8] sm:$0xff]  ;;  %v1168_v43 = vld [vmem:[#allocation2 + $0xe8] sm:$0xff] }
 0x36f   : > { %v1317_v56 = vpop.permute.xlu1 %1316 }
 0x370   : > { %v1347_v58 = vmul.f32 %v1317_v56, %v1142_v54  ;;  %v1310_v54 = vadd.f32 %v1302_v51, %v1262_v47 }
 0x372   : > { %v1355_v59 = vadd.f32 %v1347_v58, %v1307_v57  ;;  %v1164_v58 = vld [vmem:[#allocation2 + $0xc8] sm:$0xff] }
 0x374   : > { %v1194_v60 = vpop.permute.xlu1 %1193  ;;  %v1370_v61 = vadd.f32 %v2752_v40, %v1355_v59 }
 0x375   : > { %v1215_v35 = vmul.f32 %v1194_v60, %v1155_v29  ;;  %v1165_v60 = vld [vmem:[#allocation2 + $0xd0] sm:$0xff] }
 0x376   : > { %v1378_v0 = vmax.f32 %v1370_v61, 0.0  ;;  %v1161_v29 = vld [vmem:[#allocation2 + $0xb0] sm:$0xff] }
 0x378   : > { %v1393_v3 = vmul.f32 %v2758_v45, %v1378_v0  ;;  %v1217_v0 = vmul.f32 %v1204_v20, %v1163_v22 }
 0x379   : > { %v1237_v5 = vpop.permute.xlu1 %1236 }
 0x37a   : > { %1401 = vadd.xlane.f32.xlu1 %v1393_v3  ;;  %v1255_v30 = vmul.f32 %v1237_v5, %v1156_v23  ;;  %v1341_v3 = vpop.permute.xlu0 %1340  ;;  %v1305_v5 = vmul.f32 %v1293_v53, %v1165_v60  ;;  %v1159_v23 = vld [vmem:[#allocation2 + $0xa0] sm:$0xff]  ;;  %v1485_v60 = vsel %vm1026_vm1, %v2688_v25, -inf }
 0x37c   : > { %v1263_v44 = vadd.f32 %v1255_v30, %v1215_v35  ;;  %v1162_v35 = vld [vmem:[#allocation2 + $0xb8] sm:$0xff] }
 0x37e   : > { %v1325_v11 = vpop.permute.xlu1 %1324 }
 0x37f   : > { %v1349_v13 = vmul.f32 %v1325_v11, %v1150_v9  ;;  %v1353_v9 = vmul.f32 %v1341_v3, %v1166_v62 }
 0x381   : > { %v1357_v14 = vadd.f32 %v1349_v13, %v1309_v12 }
 0x383   : > { %v1199_v27 = vpop.permute.xlu1 %1198  ;;  %v1372_v28 = vadd.f32 %v2752_v40, %v1357_v14 }
 0x384   : > { %v1216_v21 = vmul.f32 %v1199_v27, %v1159_v23  ;;  %v1167_v27 = vld [vmem:[#allocation2 + $0xe0] sm:$0xff] }
 0x385   : > { %v1380_v31 = vmax.f32 %v1372_v28, 0.0  ;;  %v1160_v28 = vld [vmem:[#allocation2 + $0xa8] sm:$0xff] }
 0x386   : > { %v1256_v19 = vmul.f32 %v2763_v8, %v1160_v28 }
 0x387   : > { %v1395_v36 = vmul.f32 %v2758_v45, %v1380_v31  ;;  %v1470_v31 = vsel %vm1026_vm1, %v2669_v15, -inf  ;;  %v1482_v15 = vsel %vm1026_vm1, %v2685_v24, -inf }
 0x388   : > { %v1285_v41 = vpop.permute.xlu1 %1284 }
 0x389   : > { %v1303_v46 = vmul.f32 %v1285_v41, %v1157_v34  ;;  %1405 = vadd.xlane.f32.xlu0 %v1395_v36  ;;  %v1264_v36 = vadd.f32 %v1256_v19, %v1216_v21 }
 0x38b   : > { %v1311_v49 = vadd.f32 %v1303_v46, %v1263_v44  ;;  %v1169_v46 = vld [vmem:[#allocation2 + $0xf0] sm:$0xff] }
 0x38d   : > { %v1359_v52 = vadd.f32 %v1351_v48, %v1311_v49  ;;  %v1329_v42 = vpop.permute.xlu1 %1328 }
 0x38e   : > { %v1350_v55 = vmul.f32 %v1329_v42, %v1154_v50 }
 0x38f   : > { %v1374_v56 = vadd.f32 %v2752_v40, %v1359_v52  ;;  %v1170_v52 = vld [vmem:[#allocation2 + $0xf8] sm:$0xff] }
 0x390   : > { %v1358_v57 = vadd.f32 %v1350_v55, %v1310_v54 }
 0x391   : > { %v1382_v59 = vmax.f32 %v1374_v56, 0.0 }
 0x392   : > { %v1245_v61 = vpop.permute.xlu1 %1244  ;;  %v1373_v63 = vadd.f32 %v2752_v40, %v1358_v57 }
 0x393   : > { %v1257_v1 = vmul.f32 %v1245_v61, %v1164_v58  ;;  %v1397_v2 = vmul.f32 %v2758_v45, %v1382_v59  ;;  %v1473_v59 = vsel %vm1026_vm1, %v2675_v17, -inf  ;;  %v1491_v61 = vsel %vm1026_vm1, %v2700_v33, -inf }
 0x394   : > { %v1381_v4 = vmax.f32 %v1373_v63, 0.0 }
 0x395   : > { %v1265_v6 = vadd.f32 %v1257_v1, %v1217_v0  ;;  %1409 = vadd.xlane.f32.xlu0 %v1397_v2  ;;  %v1428_v1 = vlaneseq }
 0x396   : > { %v1396_v7 = vmul.f32 %v2758_v45, %v1381_v4 }
 0x397   : > { %v1313_v10 = vadd.f32 %v1305_v5, %v1265_v6  ;;  %v1289_v11 = vpop.permute.xlu1 %1288  ;;  %v2808_v4 = vshrl.u32 %v1428_v1, 7 }
 0x398   : > { %1407 = vadd.xlane.f32.xlu1 %v1396_v7  ;;  %v1304_v34 = vmul.f32 %v1289_v11, %v1161_v29 }
 0x399   : > { %v1361_v12 = vadd.f32 %v1353_v9, %v1313_v10  ;;  %v1430_v11 = vadd.s32 8, %v2808_v4  ;;  %v1431_v28 = vadd.s32 16, %v2808_v4 }
 0x39a   : > { %v1312_v39 = vadd.f32 %v1304_v34, %v1264_v36 }
 0x39b   : > { %v1376_v13 = vadd.f32 %v2752_v40, %v1361_v12 }
 0x39c   : > { %v1209_v14 = vpop.permute.xlu1 %1208 }
 0x39d   : > { %v1384_v20 = vmax.f32 %v1376_v13, 0.0  ;;  %v1218_v49 = vmul.f32 %v1209_v14, %v1167_v27  ;;  %v1434_v27 = vadd.s32 40, %v2808_v4 }
 0x39f   : > { %v1399_v26 = vmul.f32 %v2758_v45, %v1384_v20  ;;  %v2820_v20 = vstv %s1923_s1 }
 0x3a0   : > { %v2824_v23 = vadd.s32 %v2820_v20, %v2808_v4  ;;  %v2828_v21 = vadd.s32 %v2820_v20, %v1430_v11  ;;  %v2838_v36 = vadd.s32 %v2820_v20, %v1431_v28 }
 0x3a1   : > { %v1249_v30 = vpop.permute.xlu1 %1248  ;;  %1413 = vadd.xlane.f32.xlu0 %v1399_v26 }
 0x3a2   : > { %v1258_v47 = vmul.f32 %v1249_v30, %v1168_v43  ;;  %v1432_v30 = vadd.s32 24, %v2808_v4  ;;  %vm1446_vm3 = vcmp.lt.s32.totalorder %v2824_v23, 64  ;;  %vm1447_vm6 = vcmp.lt.s32.totalorder %v2828_v21, 64 }
 0x3a3   : > { %vm1448_vm12 = vcmp.lt.s32.totalorder %v2838_v36, 64 }
 0x3a4   : > { %v1266_v42 = vadd.f32 %v1258_v47, %v1218_v49  ;;  %v1435_v49 = vadd.s32 48, %v2808_v4 }
 0x3a5   : > { %1471 = vmax.xlane.f32.xlu0 %v1470_v31 }
 0x3a6   : > { %v1337_v37 = vpop.permute.xlu1 %1336 }
 0x3a7   : > { %v1352_v41 = vmul.f32 %v1337_v37, %v1162_v35  ;;  %v2845_v37 = vadd.s32 %v2820_v20, %v1432_v30 }
 0x3a9   : > { %v1360_v44 = vadd.f32 %v1352_v41, %v1312_v39  ;;  %1477 = vmax.xlane.f32.xlu0 %v1476_v38  ;;  %v1433_v41 = vadd.s32 32, %v2808_v4  ;;  %vm1449_vm14 = vcmp.lt.s32.totalorder %v2845_v37, 64 }
 0x3ab   : > { %v1297_v8 = vpop.permute.xlu1 %1296  ;;  %v1375_v48 = vadd.f32 %v2752_v40, %v1360_v44 }
 0x3ac   : > { %v1306_v50 = vmul.f32 %v1297_v8, %v1169_v46  ;;  %v2405_v8 = vmov 0.0  }
 0x3ad   : > { %v1383_v51 = vmax.f32 %v1375_v48, 0.0  ;;  %1483 = vmax.xlane.f32.xlu0 %v1482_v15  ;;  %v2862_v15 = vadd.s32 %v2820_v20, %v1433_v41  ;;  %v1924_v21 = vsel %vm1446_vm3, 1.0, %v2405_v8  ;;  %v1926_v23 = vsel %vm1448_vm12, 1.0, %v2405_v8 }
 0x3ae   : > { %v1314_v55 = vadd.f32 %v1306_v50, %v1266_v42 }
 0x3af   : > { %v1398_v53 = vmul.f32 %v2758_v45, %v1383_v51  ;;  %v2871_v51 = vadd.s32 %v2820_v20, %v1434_v27 }
 0x3b0   : > { %v1345_v54 = vpop.permute.xlu1 %1344 }
 0x3b1   : > { %v1354_v56 = vmul.f32 %v1345_v54, %v1170_v52  ;;  %1411 = vadd.xlane.f32.xlu1 %v1398_v53  ;;  %1489 = vmax.xlane.f32.xlu0 %v1488_v16 }
 0x3b3   : > { %v1362_v24 = vadd.f32 %v1354_v56, %v1314_v55 }
 0x3b5   : > { %v1377_v22 = vadd.f32 %v2752_v40, %v1362_v24  ;;  %v2795_v40 = vstv %s1417_s3 }
 0x3b7   : > { %v1385_v57 = vmax.f32 %v1377_v22, 0.0 }
 0x3b9   : > { %v1400_v58 = vmul.f32 %v2758_v45, %v1385_v57  ;;  %v2881_v57 = vadd.s32 %v2820_v20, %v1435_v49 }
 0x3bb   : > { %1415 = vadd.xlane.f32.xlu1 %v1400_v58 }
 0x3bf   : > { %1474 = vmax.xlane.f32.xlu1 %v1473_v59 }
 0x3c3   : > { %1480 = vmax.xlane.f32.xlu1 %v1479_v32 }
 0x3c7   : > { %1486 = vmax.xlane.f32.xlu1 %v1485_v60 }
 0x3cb   : > { %1492 = vmax.xlane.f32.xlu1 %v1491_v61 }
 0x3fa   : > { %v1404_v45 = vpop.xlane.xlu0 %1403 }
 0x3fb   : > { %v2798_v17 = vadd.f32 %v2795_v40, %v1404_v45 }
 0x3fd   : > { %v1543_v25 = vand.u32 2147483647, %v2798_v17  ;;  %vm1657_vm4 = vcmp.ge.f32.partialorder %v2798_v17, 0.0 }
 0x3fe   : > { %vm1665_vm8 = vmxor %vm1657_vm4, %vm1447_vm6 }
 0x3ff   : > { %v1551_v3 = vsub.f32 0.0, %v1543_v25  ;;  %vm1673_vm0 = vmxor %vm1665_vm8, %vm2404_vm10 }
 0x400   : > { %v1933_v42 = vsel %vm1673_vm0, 1.0, %v2405_v8 }
 0x401   : > { %v1560_v10 = vmul.f32 1.442695, %v1551_v3 }
 0x403   : > { %2190 = vpow2.f32 %v1560_v10 }
 0x407   : > { %v1402_v63 = vpop.xlane.xlu1 %1401 }
 0x408   : > { %v2801_v18 = vadd.f32 %v2795_v40, %v1402_v63 }
 0x40a   : > { %v1542_v33 = vand.u32 2147483647, %v2801_v18  ;;  %vm1656_vm2 = vcmp.ge.f32.partialorder %v2801_v18, 0.0 }
 0x40b   : > { %vm1664_vm5 = vmxor %vm1656_vm2, %vm1446_vm3 }
 0x40c   : > { %v1550_v9 = vsub.f32 0.0, %v1542_v33  ;;  %vm1672_vm11 = vmxor %vm1664_vm5, %vm2404_vm10  ;;  %vm1630_vm5 = vcmask 7168  }
 0x40d   : > { %v2191_v46 = vpop.eup %2190  ;;  %v1932_v48 = vsel %vm1672_vm11, 1.0, %v2405_v8  ;;  %v1697_v32 = vsel %vm1630_vm5, %v1933_v42, 0.0 }
 0x40e   : > { %v1558_v26 = vmul.f32 1.442695, %v1550_v9  ;;  %v1575_v16 = vadd.f32 1.0, %v2191_v46  ;;  %v1696_v55 = vsel %vm1630_vm5, %v1932_v48, 0.0 }
 0x40f   : > { %v1698_v61 = vadd.f32 %v1697_v32, %v1696_v55  ;;  %v1519_v32 = vld [vmem:[%s2620_s12 + $0x8] sm:$0xff] }
 0x410   : > { %2192 = vpow2.f32 %v1558_v26 }
 0x416   : > { %v1406_v0 = vpop.xlane.xlu0 %1405 }
 0x417   : > { %v2805_v2 = vadd.f32 %v2795_v40, %v1406_v0 }
 0x419   : > { %v1544_v5 = vand.u32 2147483647, %v2805_v2  ;;  %vm1658_vm7 = vcmp.ge.f32.partialorder %v2805_v2, 0.0 }
 0x41a   : > { %vm1666_vm13 = vmxor %vm1658_vm7, %vm1448_vm12  ;;  %v2193_v50 = vpop.eup %2192  ;;  %vm1450_vm7 = vcmp.lt.s32.totalorder %v2862_v15, 64 }
 0x41b   : > { %v1552_v12 = vsub.f32 0.0, %v1544_v5  ;;  %vm1674_vm1 = vmxor %vm1666_vm13, %vm2404_vm10  ;;  %v1574_v24 = vadd.f32 1.0, %v2193_v50  ;;  %v1535_v50 = vmax.f32 %v2798_v17, 0.0  ;;  %v1928_v37 = vsel %vm1450_vm7, 1.0, %v2405_v8 }
 0x41c   : > { %v1934_v52 = vsel %vm1674_vm1, 1.0, %v2405_v8  ;;  %vm1452_vm1 = vcmp.lt.s32.totalorder %v2881_v57, 64 }
 0x41d   : > { %v1562_v31 = vmul.f32 1.442695, %v1552_v12  ;;  %v1699_v58 = vsel %vm1630_vm5, %v1934_v52, 0.0 }
 0x41e   : > { %v1700_v25 = vadd.f32 %v1699_v58, %v1698_v61 }
 0x41f   : > { %2194 = vpow2.f32 %v1562_v31 }
 0x422   : > { %v1410_v7 = vpop.xlane.xlu0 %1409 }
 0x423   : > { %v2817_v13 = vadd.f32 %v2795_v40, %v1410_v7 }
 0x425   : > { %v1408_v62 = vpop.xlane.xlu1 %1407  ;;  %v1546_v19 = vand.u32 2147483647, %v2817_v13  ;;  %vm1660_vm2 = vcmp.ge.f32.partialorder %v2817_v13, 0.0 }
 0x426   : > { %v2812_v6 = vadd.f32 %v2795_v40, %v1408_v62  ;;  %vm1668_vm8 = vmxor %vm1660_vm2, %vm1450_vm7  ;;  %v1436_v62 = vadd.s32 56, %v2808_v4 }
 0x427   : > { %v1554_v38 = vsub.f32 0.0, %v1546_v19  ;;  %vm1676_vm11 = vmxor %vm1668_vm8, %vm2404_vm10 }
 0x428   : > { %v1545_v14 = vand.u32 2147483647, %v2812_v6  ;;  %vm1659_vm9 = vcmp.ge.f32.partialorder %v2812_v6, 0.0  ;;  %v1936_v33 = vsel %vm1676_vm11, 1.0, %v2405_v8  ;;  %v2904_v11 = vadd.s32 %v2820_v20, %v1436_v62 }
 0x429   : > { %v1566_v44 = vmul.f32 1.442695, %v1554_v38  ;;  %vm1667_vm15 = vmxor %vm1659_vm9, %vm1449_vm14  ;;  %v2195_v53 = vpop.eup %2194  ;;  %vm1451_vm9 = vcmp.lt.s32.totalorder %v2871_v51, 64  ;;  %v1703_v4 = vsel %vm1630_vm5, %v1936_v33, 0.0  ;;  %v1930_v51 = vsel %vm1452_vm1, 1.0, %v2405_v8 }
 0x42a   : > { %v1553_v34 = vsub.f32 0.0, %v1545_v14  ;;  %vm1675_vm4 = vmxor %vm1667_vm15, %vm2404_vm10  ;;  %v1576_v60 = vadd.f32 1.0, %v2195_v53  ;;  %vm1453_vm11 = vcmp.lt.s32.totalorder %v2904_v11, 64 }
 0x42b   : > { %v1935_v56 = vsel %vm1675_vm4, 1.0, %v2405_v8 }
 0x42c   : > { %v1564_v39 = vmul.f32 1.442695, %v1553_v34  ;;  %v1701_v45 = vsel %vm1630_vm5, %v1935_v56, 0.0 }
 0x42d   : > { %v1702_v7 = vadd.f32 %v1701_v45, %v1700_v25  ;;  %v1518_v25 = vld [vmem:[%s2620_s12] sm:$0xff] }
 0x42e   : > { %v1414_v29 = vpop.xlane.xlu0 %1413  ;;  %2196 = vpow2.f32 %v1564_v39 }
 0x42f   : > { %v2835_v35 = vadd.f32 %v2795_v40, %v1414_v29  ;;  %2198 = vpow2.f32 %v1566_v44  ;;  %v1704_v28 = vadd.f32 %v1703_v4, %v1702_v7 }
 0x430   : > { %2200 = vlog2.f32 %v1575_v16 }
 0x431   : > { %v1548_v43 = vand.u32 2147483647, %v2835_v35  ;;  %vm1662_vm15 = vcmp.ge.f32.partialorder %v2835_v35, 0.0  ;;  %v1612_v36 = vmul.f32 %v1930_v51, %v2835_v35 }
 0x432   : > { %vm1670_vm4 = vmxor %vm1662_vm15, %vm1452_vm1  ;;  %v1472_v41 = vpop.xlane.xlu0 %1471 }
 0x433   : > { %v1556_v47 = vsub.f32 0.0, %v1548_v43  ;;  %vm1678_vm8 = vmxor %vm1670_vm4, %vm2404_vm10 }
 0x434   : > { %v1938_v31 = vsel %vm1678_vm8, 1.0, %v2405_v8  ;;  %vm2933_vm8 = vmxor %vm1446_vm3, %vm2404_vm10 }
 0x435   : > { %v1570_v54 = vmul.f32 1.442695, %v1556_v47  ;;  %v1707_v44 = vsel %vm1630_vm5, %v1938_v31, 0.0  ;;  %vm2968_vm3 = vmxor %vm1448_vm12, %vm2404_vm10 }
 0x436   : > { %v1478_v58 = vpop.xlane.xlu0 %1477  ;;  %vm2980_vm12 = vmxor %vm1449_vm14, %vm2404_vm10 }
 0x437   : > { %2202 = vpow2.f32 %v1570_v54  ;;  %v1925_v54 = vsel %vm1447_vm6, 1.0, %v2405_v8 }
 0x438   : > { %v2197_v63 = vpop.eup %2196  ;;  %2204 = vlog2.f32 %v1574_v24  ;;  %v1534_v24 = vmax.f32 %v2801_v18, 0.0  ;;  %v1607_v62 = vmul.f32 %v1925_v54, %v2798_v17  ;;  %v1606_v17 = vmul.f32 %v1924_v21, %v2801_v18  ;;  %v1520_v18 = vld [vmem:[%s2620_s12 + $0x10] sm:$0xff] }
 0x439   : > { %2206 = vlog2.f32 %v1576_v60  ;;  %v1577_v3 = vadd.f32 1.0, %v2197_v63  ;;  %v2199_v9 = vpop.eup %2198  ;;  %v1929_v60 = vsel %vm1451_vm9, 1.0, %v2405_v8 }
 0x43a   : > { %v1578_v14 = vadd.f32 1.0, %v2199_v9  ;;  %v2201_v30 = vpop.eup %2200 }
 0x43b   : > { %v1585_v43 = vmul.f32 0.6931472, %v2201_v30  ;;  %v1608_v30 = vmul.f32 %v1926_v23, %v2805_v2 }
 0x43d   : > { %v1599_v61 = vadd.f32 %v1585_v43, %v1535_v50 }
 0x43e   : > { %v1412_v22 = vpop.xlane.xlu1 %1411 }
 0x43f   : > { %v2885_v59 = vadd.f32 %v2795_v40, %v1412_v22 }
 0x441   : > { %v1547_v0 = vand.u32 2147483647, %v2885_v59  ;;  %vm1661_vm13 = vcmp.ge.f32.partialorder %v2885_v59, 0.0  ;;  %v2203_v34 = vpop.eup %2202  ;;  %v1611_v23 = vmul.f32 %v1929_v60, %v2885_v59 }
 0x442   : > { %vm1669_vm0 = vmxor %vm1661_vm13, %vm1451_vm9  ;;  %v2205_v38 = vpop.eup %2204  ;;  %v1580_v47 = vadd.f32 1.0, %v2203_v34  ;;  %v1484_v34 = vpop.xlane.xlu0 %1483 }
 0x443   : > { %v1555_v1 = vsub.f32 0.0, %v1547_v0  ;;  %vm1677_vm2 = vmxor %vm1669_vm0, %vm2404_vm10  ;;  %v2207_v27 = vpop.eup %2206  ;;  %v1583_v52 = vmul.f32 0.6931472, %v2205_v38  ;;  %v1536_v0 = vmax.f32 %v2805_v2, 0.0 }
 0x444   : > { %v1937_v5 = vsel %vm1677_vm2, 1.0, %v2405_v8  ;;  %vm2923_vm2 = vmxor %vm1447_vm6, %vm2404_vm10  ;;  %v1587_v22 = vmul.f32 0.6931472, %v2207_v27 }
 0x445   : > { %v1568_v10 = vmul.f32 1.442695, %v1555_v1  ;;  %v1705_v12 = vsel %vm1630_vm5, %v1937_v5, 0.0  ;;  %v1598_v1 = vadd.f32 %v1583_v52, %v1534_v24  ;;  %v1522_v24 = vld [vmem:[%s2620_s12 + $0x20] sm:$0xff] }
 0x446   : > { %v1706_v19 = vadd.f32 %v1705_v12, %v1704_v28  ;;  %v1600_v9 = vadd.f32 %v1587_v22, %v1536_v0  ;;  %v1610_v22 = vmul.f32 %v1928_v37, %v2817_v13  ;;  %v1523_v0 = vld [vmem:[%s2620_s12 + $0x28] sm:$0xff] }
 0x447   : > { %2208 = vpow2.f32 %v1568_v10  ;;  %v1615_v10 = vsub.f32 %v1599_v61, %v1607_v62  ;;  %v1614_v28 = vsub.f32 %v1598_v1, %v1606_v17  ;;  %v1539_v61 = vmax.f32 %v2885_v59, 0.0  ;;  %v1524_v59 = vld [vmem:[%s2620_s12 + $0x30] sm:$0xff] }
 0x448   : > { %v1416_v26 = vpop.xlane.xlu1 %1415  ;;  %2210 = vlog2.f32 %v1577_v3  ;;  %v1708_v49 = vadd.f32 %v1707_v44, %v1706_v19  ;;  %v1540_v1 = vmax.f32 %v2835_v35, 0.0  ;;  %v1931_v35 = vsel %vm1453_vm11, 1.0, %v2405_v8 }
 0x449   : > { %v2910_v29 = vadd.f32 %v2795_v40, %v1416_v26  ;;  %2212 = vlog2.f32 %v1578_v14  ;;  %v1537_v26 = vmax.f32 %v2812_v6, 0.0 }
 0x44b   : > { %v1549_v20 = vand.u32 2147483647, %v2910_v29  ;;  %vm1663_vm13 = vcmp.ge.f32.partialorder %v2910_v29, 0.0  ;;  %v1613_v2 = vmul.f32 %v1931_v35, %v2910_v29 }
 0x44c   : > { %v1475_v39 = vpop.xlane.xlu1 %1474  ;;  %vm1671_vm15 = vmxor %vm1663_vm13, %vm1453_vm11  ;;  %vm1502_vm13 = vcmp.lt.f32.partialorder %v1472_v41, -230.0 }
 0x44d   : > { %v1557_v40 = vsub.f32 0.0, %v1549_v20  ;;  %vm1679_vm0 = vmxor %vm1671_vm15, %vm2404_vm10  ;;  %vm1503_vm4 = vcmp.lt.f32.partialorder %v1475_v39, -230.0  ;;  %v1927_v20 = vsel %vm1449_vm14, 1.0, %v2405_v8  ;;  %v1616_v39 = vsub.f32 %v1600_v9, %v1608_v30 }
 0x44e   : > { %v1939_v48 = vsel %vm1679_vm0, 1.0, %v2405_v8  ;;  %vm2945_vm15 = vmand %vm2923_vm2, %vm1503_vm4  ;;  %vm1504_vm0 = vcmp.lt.f32.partialorder %v1478_v58, -230.0  ;;  %v1609_v50 = vmul.f32 %v1927_v20, %v2812_v6 }
 0x44f   : > { %v1572_v16 = vmul.f32 1.442695, %v1557_v40  ;;  %v1709_v42 = vsel %vm1630_vm5, %v1939_v48, 0.0  ;;  %vm2957_vm6 = vmand %vm2933_vm8, %vm1502_vm13  ;;  %v1527_v7 = vsel %vm2945_vm15, 0.0, %v1519_v32  ;;  %v1521_v40 = vld [vmem:[%s2620_s12 + $0x18] sm:$0xff]  ;;  %vm1506_vm13 = vcmp.lt.f32.partialorder %v1484_v34, -230.0 }
 0x450   : > { %v1710_v55 = vadd.f32 %v1709_v42, %v1708_v49  ;;  %v1481_v3 = vpop.xlane.xlu1 %1480  ;;  %v1526_v14 = vsel %vm2957_vm6, 0.0, %v1518_v25  ;;  %vm2990_vm4 = vmand %vm2968_vm3, %vm1504_vm0  ;;  %v1623_v19 = vmul.f32 %v1615_v10, %v1527_v7  ;;  %v1541_v34 = vmax.f32 %v2910_v29, 0.0 }
 0x451   : > { %v2209_v56 = vpop.eup %2208  ;;  %2214 = vpow2.f32 %v1572_v16  ;;  %vm1505_vm2 = vcmp.lt.f32.partialorder %v1481_v3, -230.0  ;;  %v1622_v38 = vmul.f32 %v1614_v28, %v1526_v14  ;;  %v1528_v27 = vsel %vm2990_vm4, 0.0, %v1520_v18  ;;  %vm3013_vm14 = vmxor %vm1450_vm7, %vm2404_vm10 }
 0x452   : > { %v2211_v45 = vpop.eup %2210  ;;  %2216 = vlog2.f32 %v1580_v47  ;;  %1711 = vadd.xlane.f32.xlu1 %v1710_v55  ;;  %v1579_v63 = vadd.f32 1.0, %v2209_v56  ;;  %vm3000_vm8 = vmand %vm2980_vm12, %vm1505_vm2  ;;  %v1538_v47 = vmax.f32 %v2817_v13, 0.0  ;;  %v1632_v49 = vsel %vm1630_vm5, %v1623_v19, 0.0 }
 0x453   : > { %v1589_v4 = vmul.f32 0.6931472, %v2211_v45  ;;  %v2213_v12 = vpop.eup %2212  ;;  %v1529_v16 = vsel %vm3000_vm8, 0.0, %v1521_v40  ;;  %vm3024_vm15 = vmxor %vm1451_vm9, %vm2404_vm10  ;;  %v1631_v53 = vsel %vm1630_vm5, %v1622_v38, 0.0  ;;  %v1624_v54 = vmul.f32 %v1616_v39, %v1528_v27  ;;  %v1525_v38 = vld [vmem:[%s2620_s12 + $0x38] sm:$0xff] }
 0x454   : > { %2218 = vlog2.f32 %v1579_v63  ;;  %v1591_v41 = vmul.f32 0.6931472, %v2213_v12  ;;  %v1487_v44 = vpop.xlane.xlu1 %1486  ;;  %vm3034_vm6 = vmand %vm3013_vm14, %vm1506_vm13  ;;  %v1633_v32 = vadd.f32 %v1632_v49, %v1631_v53  ;;  %v1490_v63 = vpop.xlane.xlu0 %1489 }
 0x455   : > { %v1601_v43 = vadd.f32 %v1589_v4, %v1537_v26  ;;  %vm1507_vm7 = vcmp.lt.f32.partialorder %v1487_v44, -230.0  ;;  %v1634_v33 = vsel %vm1630_vm5, %v1624_v54, 0.0  ;;  %v1530_v5 = vsel %vm3034_vm6, 0.0, %v1522_v24  ;;  %vm1500_vm9 = vmxor %vm1452_vm1, %vm2404_vm10 }
 0x456   : > { %v1602_v55 = vadd.f32 %v1591_v41, %v1538_v47  ;;  %vm3046_vm3 = vmand %vm3024_vm15, %vm1507_vm7  ;;  %v1635_v7 = vadd.f32 %v1634_v33, %v1633_v32  ;;  %vm1508_vm0 = vcmp.lt.f32.partialorder %v1490_v63, -230.0  ;;  %v1721_v32 = vld [vmem:[#allocation9] sm:$0x1] }
 0x457   : > { %v1617_v56 = vsub.f32 %v1601_v43, %v1609_v50  ;;  %v1531_v17 = vsel %vm3046_vm3, 0.0, %v1523_v0  ;;  %vm3066_vm12 = vmand %vm1500_vm9, %vm1508_vm0 }
 0x458   : > { %v1618_v62 = vsub.f32 %v1602_v55, %v1610_v22  ;;  %v1493_v12 = vpop.xlane.xlu1 %1492  ;;  %vm1501_vm1 = vmxor %vm1453_vm11, %vm2404_vm10  ;;  %v1532_v31 = vsel %vm3066_vm12, 0.0, %v1524_v59  ;;  %vm1724_vm10 = vcmask 0  }
 0x459   : > { %v1625_v45 = vmul.f32 %v1617_v56, %v1529_v16  ;;  %vm1509_vm2 = vcmp.lt.f32.partialorder %v1493_v12, -230.0 }
 0x45a   : > { %v1626_v14 = vmul.f32 %v1618_v62, %v1530_v5  ;;  %vm1517_vm4 = vmand %vm1501_vm1, %vm1509_vm2 }
 0x45b   : > { %v2215_v46 = vpop.eup %2214  ;;  %v1636_v9 = vsel %vm1630_vm5, %v1625_v45, 0.0  ;;  %v1533_v44 = vsel %vm1517_vm4, 0.0, %v1525_v38  ;;  %v1726_v45 = vld [vmem:[#allocation10] sm:$0x1] }
 0x45c   : > { %v2217_v52 = vpop.eup %2216  ;;  %v1581_v15 = vadd.f32 1.0, %v2215_v46  ;;  %v1637_v28 = vadd.f32 %v1636_v9, %v1635_v7  ;;  %v1638_v19 = vsel %vm1630_vm5, %v1626_v14, 0.0 }
 0x45d   : > { %v1595_v21 = vmul.f32 0.6931472, %v2217_v52 }
 0x45e   : > { %v2219_v6 = vpop.eup %2218  ;;  %2220 = vlog2.f32 %v1581_v15  ;;  %v1639_v41 = vadd.f32 %v1638_v19, %v1637_v28 }
 0x45f   : > { %v1593_v13 = vmul.f32 0.6931472, %v2219_v6  ;;  %v1604_v10 = vadd.f32 %v1595_v21, %v1540_v1 }
 0x461   : > { %v1603_v3 = vadd.f32 %v1593_v13, %v1539_v61  ;;  %v1620_v18 = vsub.f32 %v1604_v10, %v1612_v36 }
 0x463   : > { %v1619_v4 = vsub.f32 %v1603_v3, %v1611_v23  ;;  %v1628_v40 = vmul.f32 %v1620_v18, %v1532_v31 }
 0x465   : > { %v1627_v57 = vmul.f32 %v1619_v4, %v1531_v17  ;;  %v1642_v8 = vsel %vm1630_vm5, %v1628_v40, 0.0 }
 0x467   : > { %v1640_v20 = vsel %vm1630_vm5, %v1627_v57, 0.0 }
 0x468   : > { %v2221_v30 = vpop.eup %2220  ;;  %v1641_v27 = vadd.f32 %v1640_v20, %v1639_v41 }
 0x469   : > { %v1597_v39 = vmul.f32 0.6931472, %v2221_v30 }
 0x46a   : > { %v1643_v11 = vadd.f32 %v1642_v8, %v1641_v27 }
 0x46b   : > { %v1605_v43 = vadd.f32 %v1597_v39, %v1541_v34 }
 0x46d   : > { %v1621_v37 = vsub.f32 %v1605_v43, %v1613_v2 }
 0x46f   : > { %v1629_v46 = vmul.f32 %v1621_v37, %v1533_v44 }
 0x471   : > { %v1644_v47 = vsel %vm1630_vm5, %v1629_v46, 0.0 }
 0x472   : > { %v1645_v48 = vadd.f32 %v1644_v47, %v1643_v11 }
 0x474   : > { %1646 = vadd.xlane.f32.xlu0 %v1645_v48 }
 0x4df   : > { %v1712_v49 = vpop.xlane.xlu1 %1711 }
 0x4e0   : > { %v1713_v50 = vrot.slane %v1712_v49, 4 }
 0x4e2   : > { %v1714_v52 = vadd.f32 %v1713_v50, %v1712_v49 }
 0x4e4   : > { %v1715_v16 = vrot.slane %v1714_v52, 2 }
 0x4e6   : > { %v1716_v54 = vadd.f32 %v1715_v16, %v1714_v52 }
 0x4e8   : > { %v1717_v56 = vrot.slane %v1716_v54, 1 }
 0x4ea   : > { %v1718_v22 = vadd.f32 %v1717_v56, %v1716_v54 }
 0x501   : > { %v1647_v42 = vpop.xlane.xlu0 %1646 }
 0x502   : > { %v1648_v15 = vrot.slane %v1647_v42, 4 }
 0x504   : > { %v1649_v53 = vadd.f32 %v1648_v15, %v1647_v42 }
 0x506   : > { %v1650_v29 = vrot.slane %v1649_v53, 2 }
 0x508   : > { %v1651_v55 = vadd.f32 %v1650_v29, %v1649_v53 }
 0x50a   : > { %v1652_v6 = vrot.slane %v1651_v55, 1 }
 0x50c   : > { %v1653_v24 = vadd.f32 %v1652_v6, %v1651_v55 }
 0x50e   : > { %1949 = vpush %v1653_v24 }
 0x50f   : > { %1951 = vpush %v1718_v22 }
 0x53f   : > { %s1950_s0 = spop %1949 }
 0x540   : > { %v1655_v58 = vstv %s1950_s0  ;;  %s1952_s13 = spop %1951 }
 0x541   : > { %v1722_v60 = vmul.f32 0.0078125, %v1655_v58  ;;  %v1720_v61 = vstv %s1952_s13 }
 0x542   : > { %v1727_v21 = vmul.f32 0.78125, %v1720_v61 }
 0x543   : > { %v1723_v63 = vadd.f32 %v1722_v60, %v1721_v32 }
 0x544   : > { %v1728_v0 = vadd.f32 %v1727_v21, %v1726_v45 }
 0x545   : > { %1725 = vst.msk [vmem:[#allocation9] sm:$0x1] %vm1724_vm10, %v1723_v63 }
 0x546   : > { %1729 = vst.msk [vmem:[#allocation10] sm:$0x1] %vm1724_vm10, %v1728_v0 }
 0x547 PF: > { %s3221_s10 = sadd.s32 4294967295, %s2392_s20   ;;  %s2406_s29 = smov [#allocation9]  }
 0x548   : > { %p3087_p12 = scmp.eq.s32.totalorder %s3221_s10, 3  ;;  %s1737_s23 = sshll.u32 %s2406_s29, 4  ;;  %s1738_s23 = int_to_ptr.vmem [resolvable:$true] %s1737_s23 }
 0x549   : > { %s2407_s22 = smov [#allocation10]   ;;  %s2250_s24 = scalar_lea.vmem %s1738_s23, 16 }
 0x54a   : > { %s1748_s30 = sshll.u32 %s2407_s22, 4  ;;  %p2251_p13 = scmp.ne.s32.totalorder %s1738_s23, %s2250_s24  ;;  %s3091_s30 = int_to_ptr.vmem [resolvable:$true] %s1748_s30 }
 0x54b   : > { %s2256_s12 = scalar_lea.vmem %s1738_s23, 32  ;;  %p2257_p3 = scmp.lt.s32.totalorder %s1738_s23, %s1738_s23 }
 0x54c   : > { %p2252_p0 = pnand %p2251_p13, %p3087_p12  ;;  %p2258_p1 = scmp.lt.s32.totalorder %s2256_s12, %s2250_s24 }
 0x54e   : > { %p2253_p2 = pneg %p2252_p0  ;;  %p2259_p4 = por %p2258_p1, %p2257_p3 }
 0x550   : > { %p2260_p5 = pnand %p2259_p4, %p2253_p2 }
 0x552   : > { %2263 = shalt.err (!%p2260_p5)
}
 0x553   : > { %s2264_s25 = scalar_lea.hbm %s3181_s8, 16 }
 0x554   : > { %p2265_p9 = scmp.ne.s32.totalorder %s3181_s8, %s2264_s25  ;;  %p2270_p8 = scmp.lt.u32.totalorder %s2264_s25, %s3181_s8 }
 0x556   : > { %p2266_p6 = pnand %p2265_p9, %p3087_p12 }
 0x558   : > { %p2267_p7 = pneg %p2266_p6 }
 0x55a   : > { %p2272_p11 = pnand %p2270_p8, %p2267_p7 }
 0x55c   : > { %2275 = shalt.err (!%p2272_p11)
}
 0x55d   : > { %1956 = dma.vmem_to_hbm [thread:$0]  (%p3087_p12), %s1738_s23, 16, %s3181_s8, [#allocation8]  }
 0x55e   : > { %s2276_s10 = scalar_lea.vmem %s3091_s30, 16  ;;  %s2282_s29 = scalar_lea.vmem %s3091_s30, 32 }
 0x55f   : > { %p2277_p10 = scmp.ne.s32.totalorder %s3091_s30, %s2276_s10  ;;  %p2283_p2 = scmp.lt.s32.totalorder %s3091_s30, %s3091_s30 }
 0x560   : > { %p2284_p3 = scmp.lt.s32.totalorder %s2282_s29, %s2276_s10 }
 0x561   : > { %p2278_p13 = pnand %p2277_p10, %p3087_p12 }
 0x562   : > { %p2285_p1 = por %p2284_p3, %p2283_p2 }
 0x563   : > { %p2279_p0 = pneg %p2278_p13 }
 0x565   : > { %p2286_p4 = pnand %p2285_p1, %p2279_p0 }
 0x567   : > { %2289 = shalt.err (!%p2286_p4)
}
 0x568   : > { %s2290_s12 = scalar_lea.hbm %s3182_s9, 16 }
 0x569   : > { %p2291_p5 = scmp.ne.s32.totalorder %s3182_s9, %s2290_s12  ;;  %p2296_p7 = scmp.lt.u32.totalorder %s2290_s12, %s3182_s9 }
 0x56b   : > { %p2292_p9 = pnand %p2291_p5, %p3087_p12 }
 0x56d   : > { %p2293_p6 = pneg %p2292_p9 }
 0x56f   : > { %p2298_p8 = pnand %p2296_p7, %p2293_p6 }
 0x571   : > { %2301 = shalt.err (!%p2298_p8)
}
 0x572   : > { %1958 = dma.vmem_to_hbm [thread:$0]  (%p3087_p12), %s3091_s30, 16, %s3182_s9, [#allocation11]  }
 0x573   : > { %2347 = dma.done.wait (%p3087_p12), [#allocation8], 16  }
 0x574   : > { %2349 = vsyncadd (%p3087_p12), [#allocation8], 4294967280 }
 0x575   : > { %2351 = dma.done.wait (%p3087_p12), [#allocation11], 16  }
 0x576   : > { %2353 = vsyncadd (%p3087_p12), [#allocation11], 4294967280 }
 0x577 PF: > { %s27_s20 = sadd.s32 1, %s2392_s20   ;;  %s3223_s0 = sld [smem:[#allocation15_spill]] }
 0x578   : > { %p24_p11 = scmp.ge.s32.totalorder %s27_s20, 6   ;;  %s3224_s30 = sld [smem:[#allocation16_spill]] }
 0x579   : > { %s3225_s1 = sld [smem:[#allocation17_spill]]  ;;  %s3226_s13 = smov %s2360_s14 }
 0x57a   : > { %s3227_s14 = smov %s2364_s15  ;;  %s3228_s15 = smov %s2534_s28 }
 0x57b   : > { %s3229_s16 = smov %s2372_s17  ;;  %s3230_s17 = smov %s2549_s11 }
 0x57c   : > { %s3231_s18 = smov %s2384_s19  ;;  %26 = sbr.rel (!%p24_p11) target bundleno = 12 (0xc), region = 164 }
 0x57e   : > { %s3232_s19 = smov %s3224_s30 }
 0x583   :  { %1765 = vsyncpa [#allocation7], 1 }
 0x584   :  { %1767 = vsyncpa [#allocation7 + $0x1], 1 }
 0x585   :  { %1768 = vsyncpa [#allocation8], 1 }
 0x586   :  { %1770 = vsyncpa [#allocation8 + $0x1], 1 }
 0x587   :  { %1771 = vsyncpa [#allocation11], 1 }

</bundles_post_ra>
